<compile_context>
chip_gen: v7x
topology: tpu7x:2x2x1
jax: 0.10.0
libtpu: 0.0.40
codegen_flags: <defaults>
</compile_context>

<pallas_src>
import jax
import jax.numpy as jnp
from jax import lax
from jax.experimental import pallas as pl
from jax.experimental.pallas import tpu as pltpu


# ---------------------------------------------------------------------------
# Kernel 1: fused 1x1 conv stack in transposed layout, one batch per grid step.
#   x_ref : (1, Cin, HW)      w*: (Cout, Cin_l)   b*: (Cout, 1)
#   o_ref : (1, 32, HW)       (channels x spatial == NCHW flatten order)
# ---------------------------------------------------------------------------
def conv_stack_kernel(x_ref, w1_ref, b1_ref, w2_ref, b2_ref, w3_ref, b3_ref, o_ref):
    x = x_ref[0]                      # (Cin, HW)
    w1 = w1_ref[...]                  # (64, Cin)
    if w1.shape[1] == 1:
        # K=1 contraction: VPU broadcast outer product, keep the MXU out of it.
        h1 = w1 * x                   # (64,1) * (1,HW) -> (64,HW)
    else:
        h1 = jnp.dot(w1, x, preferred_element_type=jnp.float32)
    h1 = jnp.maximum(h1 + b1_ref[...], 0.0)
    h2 = jnp.maximum(
        jnp.dot(w2_ref[...], h1, preferred_element_type=jnp.float32) + b2_ref[...], 0.0)
    h3 = jnp.maximum(
        jnp.dot(w3_ref[...], h2, preferred_element_type=jnp.float32) + b3_ref[...], 0.0)
    o_ref[...] = h3[None].astype(o_ref.dtype)


# ---------------------------------------------------------------------------
# Kernel 2: Linear (interface) layer, lane-dense "nt" contraction, tiled over K.
#   x_ref : (B, TK)   w_ref : (36, TK)   b_ref : (1, 36)   acc_ref : (B, 36) f32
#   out[b, j] = sum_k x[b, k] * w[j, k] + b[j]
# ---------------------------------------------------------------------------
def linear_nt_kernel(x_ref, w_ref, b_ref, o_ref, acc_ref):
    k = pl.program_id(0)

    @pl.when(k == 0)
    def _():
        acc_ref[...] = jnp.zeros_like(acc_ref)

    acc_ref[...] += lax.dot_general(
        x_ref[...], w_ref[...],
        dimension_numbers=(((1,), (1,)), ((), ())),   # contract last dims of both
        preferred_element_type=jnp.float32)

    @pl.when(k == pl.num_programs(0) - 1)
    def _():
        o_ref[...] = (acc_ref[...] + b_ref[...]).astype(o_ref.dtype)


def _pick_tile(n, align, max_tile):
    """Largest divisor of n that is a multiple of `align` and <= max_tile.

    Falls back to n itself (single full-extent block) if no aligned divisor
    exists, so the exact-division grids below never drop trailing elements.
    """
    best = None
    for t in range(align, min(n, max_tile) + 1, align):
        if n % t == 0:
            best = t
    return best if best is not None else n


def sample_cnn_forward(x, params):
    """x: (B, Cin, H, W) float32 (NCHW, like PyTorch). Returns (B, 36)."""
    B, Cin, H, W = x.shape
    HW = H * W
    x3 = x.reshape(B, Cin, HW)        # free view of NCHW

    conv_out = pl.pallas_call(
        conv_stack_kernel,
        out_shape=jax.ShapeDtypeStruct((B, 32, HW), jnp.float32),
        grid=(B,),
        in_specs=[
            pl.BlockSpec((1, Cin, HW), lambda b: (b, 0, 0)),
            pl.BlockSpec((64, Cin), lambda b: (0, 0)),
            pl.BlockSpec((64, 1), lambda b: (0, 0)),
            pl.BlockSpec((32, 64), lambda b: (0, 0)),
            pl.BlockSpec((32, 1), lambda b: (0, 0)),
            pl.BlockSpec((32, 32), lambda b: (0, 0)),
            pl.BlockSpec((32, 1), lambda b: (0, 0)),
        ],
        out_specs=pl.BlockSpec((1, 32, HW), lambda b: (b, 0, 0)),
        compiler_params=pltpu.CompilerParams(dimension_semantics=("parallel",)),
    )(x3, params["w1"], params["b1"], params["w2"], params["b2"],
      params["w3"], params["b3"])

    # conv_out is (B, 32, HW) == NCHW, so this reshape IS nn.Flatten (no transpose).
    # The second relu3 in the PyTorch forward is a no-op on non-negative values.
    F = 32 * HW
    feat = conv_out.reshape(B, F)

    TK = _pick_tile(F, 128, 8192)     # F = 23808 -> TK = 7936, grid = (3,)
    assert F % TK == 0, (F, TK)
    nk = F // TK
    out = pl.pallas_call(
        linear_nt_kernel,
        out_shape=jax.ShapeDtypeStruct((B, 36), jnp.float32),
        grid=(nk,),
        in_specs=[
            pl.BlockSpec((B, TK), lambda k: (0, k)),
            pl.BlockSpec((36, TK), lambda k: (0, k)),
            pl.BlockSpec((1, 36), lambda k: (0, 0)),
        ],
        out_specs=pl.BlockSpec((B, 36), lambda k: (0, 0)),
        scratch_shapes=[pltpu.VMEM((B, 36), jnp.float32)],
        compiler_params=pltpu.CompilerParams(dimension_semantics=("arbitrary",)),
    )(feat, params["wl"], params["bl"])
    return out


def init_params(key, shape):
    """Deterministic synthetic parameters matching SampleCNN(__init__) shapes.

    Conv weights are stored as (Cout, Cin) (PyTorch (Cout, Cin, 1, 1) squeezed),
    biases as (Cout, 1).  The Linear weight keeps PyTorch's native (36, F)
    orientation; its bias is (1, 36).
    """
    Cin, H, W = shape
    F = 32 * H * W
    ks = jax.random.split(key, 8)
    s = 0.05
    return {
        "w1": jax.random.normal(ks[0], (64, Cin), jnp.float32) * s,
        "b1": jax.random.normal(ks[1], (64, 1), jnp.float32) * s,
        "w2": jax.random.normal(ks[2], (32, 64), jnp.float32) * s,
        "b2": jax.random.normal(ks[3], (32, 1), jnp.float32) * s,
        "w3": jax.random.normal(ks[4], (32, 32), jnp.float32) * s,
        "b3": jax.random.normal(ks[5], (32, 1), jnp.float32) * s,
        "wl": jax.random.normal(ks[6], (36, F), jnp.float32) * s,
        "bl": jax.random.normal(ks[7], (1, 36), jnp.float32) * s,
    }


if __name__ == "__main__":
    key = jax.random.PRNGKey(0)
    k_param, k_x = jax.random.split(key)

    # Module default input shape (Cin=1, H=62, W=12); small batch.
    shape = (1, 62, 12)
    B = 4
    params = init_params(k_param, shape)
    x = jax.random.normal(k_x, (B, *shape), jnp.float32)  # NCHW, like PyTorch

    fwd = jax.jit(sample_cnn_forward)
    out = fwd(x, params)
    out = jax.block_until_ready(out)
    assert out.shape == (B, 36), out.shape
    print("KERNEL_OK")
</pallas_src>

<mosaic_0001>
module attributes {stable_mosaic.version = 11 : i64} {
  func.func @linear_nt_kernel(%arg0: i32, %arg1: memref<4x7936xf32, #tpu.memory_space<vmem>>, %arg2: memref<36x7936xf32, #tpu.memory_space<vmem>>, %arg3: memref<1x36xf32, #tpu.memory_space<vmem>>, %arg4: memref<4x36xf32, #tpu.memory_space<vmem>>, %arg5: memref<4x36xf32, #tpu.memory_space<vmem>>) attributes {dimension_semantics = [#tpu.dimension_semantics<arbitrary>], iteration_bounds = array<i64: 3>, scalar_prefetch = 0 : i64, scratch_operands = 1 : i64, tpu.core_type = #tpu.core_type<tc>, window_params = [{transform_indices = @transform_0, window_bounds = array<i64: 4, 7936>}, {transform_indices = @transform_1, window_bounds = array<i64: 36, 7936>}, {pipeline_mode = #tpu.pipeline_mode<synchronous>, transform_indices = @transform_2, window_bounds = array<i64: 1, 36>}, {pipeline_mode = #tpu.pipeline_mode<synchronous>, transform_indices = @transform_3, window_bounds = array<i64: 4, 36>}]} {
    %c0_i32 = arith.constant 0 : i32
    %0 = arith.cmpi eq, %arg0, %c0_i32 : i32
    %1 = arith.extui %0 : i1 to i32
    %c0_i32_0 = arith.constant 0 : i32
    %2 = arith.cmpi ne, %1, %c0_i32_0 : i32
    scf.if %2 {
      %cst_9 = arith.constant 0.000000e+00 : f32
      %12 = vector.broadcast %cst_9 : f32 to vector<4x36xf32>
      %c0_10 = arith.constant 0 : index
      %c0_11 = arith.constant 0 : index
      %13 = vector.load %arg5[%c0_10, %c0_11] : memref<4x36xf32, #tpu.memory_space<vmem>>, vector<4x36xf32>
      tpu.vector_store %arg5[%c0_10, %c0_11], %12 {strides = array<i32>} : memref<4x36xf32, #tpu.memory_space<vmem>>, vector<4x36xf32>,
    } else {
    }
    %c0 = arith.constant 0 : index
    %c0_1 = arith.constant 0 : index
    %3 = vector.load %arg5[%c0, %c0_1] : memref<4x36xf32, #tpu.memory_space<vmem>>, vector<4x36xf32>
    %c0_2 = arith.constant 0 : index
    %c0_3 = arith.constant 0 : index
    %4 = vector.load %arg1[%c0_2, %c0_3] : memref<4x7936xf32, #tpu.memory_space<vmem>>, vector<4x7936xf32>
    %c0_4 = arith.constant 0 : index
    %c0_5 = arith.constant 0 : index
    %5 = vector.load %arg2[%c0_4, %c0_5] : memref<36x7936xf32, #tpu.memory_space<vmem>>, vector<36x7936xf32>
    %cst = arith.constant dense<0.000000e+00> : vector<4x36xf32>
    %6 = tpu.matmul %4, %5, %cst {dimension_numbers = #tpu.dot_dimension_numbers<[1], [1], [0], [0], [0, 0, 1, 0], [], []>} : vector<4x7936xf32>, vector<36x7936xf32>, vector<4x36xf32> -> vector<4x36xf32>
    %7 = arith.addf %3, %6 : vector<4x36xf32>
    %c0_6 = arith.constant 0 : index
    %c0_7 = arith.constant 0 : index
    %8 = vector.load %arg5[%c0_6, %c0_7] : memref<4x36xf32, #tpu.memory_space<vmem>>, vector<4x36xf32>
    tpu.vector_store %arg5[%c0_6, %c0_7], %7 {strides = array<i32>} : memref<4x36xf32, #tpu.memory_space<vmem>>, vector<4x36xf32>,
    %c2_i32 = arith.constant 2 : i32
    %9 = arith.cmpi eq, %arg0, %c2_i32 : i32
    %10 = arith.extui %9 : i1 to i32
    %c0_i32_8 = arith.constant 0 : i32
    %11 = arith.cmpi ne, %10, %c0_i32_8 : i32
    scf.if %11 {
      %c0_9 = arith.constant 0 : index
      %c0_10 = arith.constant 0 : index
      %12 = vector.load %arg5[%c0_9, %c0_10] : memref<4x36xf32, #tpu.memory_space<vmem>>, vector<4x36xf32>
      %c0_11 = arith.constant 0 : index
      %c0_12 = arith.constant 0 : index
      %13 = vector.load %arg3[%c0_11, %c0_12] : memref<1x36xf32, #tpu.memory_space<vmem>>, vector<1x36xf32>
      %14 = vector.broadcast %13 : vector<1x36xf32> to vector<4x36xf32>
      %15 = arith.addf %12, %14 : vector<4x36xf32>
      %c0_13 = arith.constant 0 : index
      %c0_14 = arith.constant 0 : index
      %16 = vector.load %arg4[%c0_13, %c0_14] : memref<4x36xf32, #tpu.memory_space<vmem>>, vector<4x36xf32>
      tpu.vector_store %arg4[%c0_13, %c0_14], %15 {strides = array<i32>} : memref<4x36xf32, #tpu.memory_space<vmem>>, vector<4x36xf32>,
    } else {
    }
    return
  }
  func.func @transform_0(%arg0: i32) -> (i32, i32) {
    %c0_i32 = arith.constant 0 : i32
    %c0_i32_0 = arith.constant 0 : i32
    return %c0_i32, %arg0 : i32, i32
  }
  func.func @transform_1(%arg0: i32) -> (i32, i32) {
    %c0_i32 = arith.constant 0 : i32
    %c0_i32_0 = arith.constant 0 : i32
    return %c0_i32, %arg0 : i32, i32
  }
  func.func @transform_2(%arg0: i32) -> (i32, i32) {
    %c0_i32 = arith.constant 0 : i32
    %c0_i32_0 = arith.constant 0 : i32
    %c0_i32_1 = arith.constant 0 : i32
    return %c0_i32, %c0_i32_0 : i32, i32
  }
  func.func @transform_3(%arg0: i32) -> (i32, i32) {
    %c0_i32 = arith.constant 0 : i32
    %c0_i32_0 = arith.constant 0 : i32
    %c0_i32_1 = arith.constant 0 : i32
    return %c0_i32, %c0_i32_0 : i32, i32
  }
}

module attributes {stable_mosaic.version = 11 : i64} {
  func.func @conv_stack_kernel(%arg0: i32, %arg1: memref<1x1x744xf32, #tpu.memory_space<vmem>>, %arg2: memref<64x1xf32, #tpu.memory_space<vmem>>, %arg3: memref<64x1xf32, #tpu.memory_space<vmem>>, %arg4: memref<32x64xf32, #tpu.memory_space<vmem>>, %arg5: memref<32x1xf32, #tpu.memory_space<vmem>>, %arg6: memref<32x32xf32, #tpu.memory_space<vmem>>, %arg7: memref<32x1xf32, #tpu.memory_space<vmem>>, %arg8: memref<1x32x744xf32, #tpu.memory_space<vmem>>) attributes {dimension_semantics = [#tpu.dimension_semantics<parallel>], iteration_bounds = array<i64: 4>, scalar_prefetch = 0 : i64, scratch_operands = 0 : i64, tpu.core_type = #tpu.core_type<tc>, window_params = [{transform_indices = @transform_0, window_bounds = array<i64: 1, 1, 744>}, {pipeline_mode = #tpu.pipeline_mode<synchronous>, transform_indices = @transform_1, window_bounds = array<i64: 64, 1>}, {pipeline_mode = #tpu.pipeline_mode<synchronous>, transform_indices = @transform_2, window_bounds = array<i64: 64, 1>}, {pipeline_mode = #tpu.pipeline_mode<synchronous>, transform_indices = @transform_3, window_bounds = array<i64: 32, 64>}, {pipeline_mode = #tpu.pipeline_mode<synchronous>, transform_indices = @transform_4, window_bounds = array<i64: 32, 1>}, {pipeline_mode = #tpu.pipeline_mode<synchronous>, transform_indices = @transform_5, window_bounds = array<i64: 32, 32>}, {pipeline_mode = #tpu.pipeline_mode<synchronous>, transform_indices = @transform_6, window_bounds = array<i64: 32, 1>}, {transform_indices = @transform_7, window_bounds = array<i64: 1, 32, 744>}]} {
    %c0 = arith.constant 0 : index
    %c0_0 = arith.constant 0 : index
    %c0_1 = arith.constant 0 : index
    %0 = vector.load %arg1[%c0, %c0_0, %c0_1] : memref<1x1x744xf32, #tpu.memory_space<vmem>>, vector<1x1x744xf32>
    %1 = vector.shape_cast %0 : vector<1x1x744xf32> to vector<1x744xf32>
    %c0_2 = arith.constant 0 : index
    %c0_3 = arith.constant 0 : index
    %2 = vector.load %arg2[%c0_2, %c0_3] : memref<64x1xf32, #tpu.memory_space<vmem>>, vector<64x1xf32>
    %3 = vector.broadcast %2 : vector<64x1xf32> to vector<64x744xf32>
    %4 = vector.broadcast %1 : vector<1x744xf32> to vector<64x744xf32>
    %5 = arith.mulf %3, %4 : vector<64x744xf32>
    %c0_4 = arith.constant 0 : index
    %c0_5 = arith.constant 0 : index
    %6 = vector.load %arg3[%c0_4, %c0_5] : memref<64x1xf32, #tpu.memory_space<vmem>>, vector<64x1xf32>
    %7 = vector.broadcast %6 : vector<64x1xf32> to vector<64x744xf32>
    %8 = arith.addf %5, %7 : vector<64x744xf32>
    %cst = arith.constant 0.000000e+00 : f32
    %9 = vector.broadcast %cst : f32 to vector<64x744xf32>
    %10 = arith.maximumf %8, %9 : vector<64x744xf32>
    %c0_6 = arith.constant 0 : index
    %c0_7 = arith.constant 0 : index
    %11 = vector.load %arg4[%c0_6, %c0_7] : memref<32x64xf32, #tpu.memory_space<vmem>>, vector<32x64xf32>
    %cst_8 = arith.constant dense<0.000000e+00> : vector<32x744xf32>
    %12 = tpu.matmul %11, %10, %cst_8 {dimension_numbers = #tpu.dot_dimension_numbers<[1], [0], [0], [1], [0, 0, 1, 1], [], []>} : vector<32x64xf32>, vector<64x744xf32>, vector<32x744xf32> -> vector<32x744xf32>
    %c0_9 = arith.constant 0 : index
    %c0_10 = arith.constant 0 : index
    %13 = vector.load %arg5[%c0_9, %c0_10] : memref<32x1xf32, #tpu.memory_space<vmem>>, vector<32x1xf32>
    %14 = vector.broadcast %13 : vector<32x1xf32> to vector<32x744xf32>
    %15 = arith.addf %12, %14 : vector<32x744xf32>
    %cst_11 = arith.constant 0.000000e+00 : f32
    %16 = vector.broadcast %cst_11 : f32 to vector<32x744xf32>
    %17 = arith.maximumf %15, %16 : vector<32x744xf32>
    %c0_12 = arith.constant 0 : index
    %c0_13 = arith.constant 0 : index
    %18 = vector.load %arg6[%c0_12, %c0_13] : memref<32x32xf32, #tpu.memory_space<vmem>>, vector<32x32xf32>
    %cst_14 = arith.constant dense<0.000000e+00> : vector<32x744xf32>
    %19 = tpu.matmul %18, %17, %cst_14 {dimension_numbers = #tpu.dot_dimension_numbers<[1], [0], [0], [1], [0, 0, 1, 1], [], []>} : vector<32x32xf32>, vector<32x744xf32>, vector<32x744xf32> -> vector<32x744xf32>
    %c0_15 = arith.constant 0 : index
    %c0_16 = arith.constant 0 : index
    %20 = vector.load %arg7[%c0_15, %c0_16] : memref<32x1xf32, #tpu.memory_space<vmem>>, vector<32x1xf32>
    %21 = vector.broadcast %20 : vector<32x1xf32> to vector<32x744xf32>
    %22 = arith.addf %19, %21 : vector<32x744xf32>
    %cst_17 = arith.constant 0.000000e+00 : f32
    %23 = vector.broadcast %cst_17 : f32 to vector<32x744xf32>
    %24 = arith.maximumf %22, %23 : vector<32x744xf32>
    %25 = vector.shape_cast %24 : vector<32x744xf32> to vector<1x32x744xf32>
    %c0_18 = arith.constant 0 : index
    %c0_19 = arith.constant 0 : index
    %c0_20 = arith.constant 0 : index
    %26 = vector.load %arg8[%c0_18, %c0_19, %c0_20] : memref<1x32x744xf32, #tpu.memory_space<vmem>>, vector<1x32x744xf32>
    tpu.vector_store %arg8[%c0_18, %c0_19, %c0_20], %25 {strides = array<i32>} : memref<1x32x744xf32, #tpu.memory_space<vmem>>, vector<1x32x744xf32>,
    return
  }
  func.func @transform_0(%arg0: i32) -> (i32, i32, i32) {
    %c0_i32 = arith.constant 0 : i32
    %c0_i32_0 = arith.constant 0 : i32
    %c0_i32_1 = arith.constant 0 : i32
    return %arg0, %c0_i32, %c0_i32_0 : i32, i32, i32
  }
  func.func @transform_1(%arg0: i32) -> (i32, i32) {
    %c0_i32 = arith.constant 0 : i32
    %c0_i32_0 = arith.constant 0 : i32
    %c0_i32_1 = arith.constant 0 : i32
    return %c0_i32, %c0_i32_0 : i32, i32
  }
  func.func @transform_2(%arg0: i32) -> (i32, i32) {
    %c0_i32 = arith.constant 0 : i32
    %c0_i32_0 = arith.constant 0 : i32
    %c0_i32_1 = arith.constant 0 : i32
    return %c0_i32, %c0_i32_0 : i32, i32
  }
  func.func @transform_3(%arg0: i32) -> (i32, i32) {
    %c0_i32 = arith.constant 0 : i32
    %c0_i32_0 = arith.constant 0 : i32
    %c0_i32_1 = arith.constant 0 : i32
    return %c0_i32, %c0_i32_0 : i32, i32
  }
  func.func @transform_4(%arg0: i32) -> (i32, i32) {
    %c0_i32 = arith.constant 0 : i32
    %c0_i32_0 = arith.constant 0 : i32
    %c0_i32_1 = arith.constant 0 : i32
    return %c0_i32, %c0_i32_0 : i32, i32
  }
  func.func @transform_5(%arg0: i32) -> (i32, i32) {
    %c0_i32 = arith.constant 0 : i32
    %c0_i32_0 = arith.constant 0 : i32
    %c0_i32_1 = arith.constant 0 : i32
    return %c0_i32, %c0_i32_0 : i32, i32
  }
  func.func @transform_6(%arg0: i32) -> (i32, i32) {
    %c0_i32 = arith.constant 0 : i32
    %c0_i32_0 = arith.constant 0 : i32
    %c0_i32_1 = arith.constant 0 : i32
    return %c0_i32, %c0_i32_0 : i32, i32
  }
  func.func @transform_7(%arg0: i32) -> (i32, i32, i32) {
    %c0_i32 = arith.constant 0 : i32
    %c0_i32_0 = arith.constant 0 : i32
    %c0_i32_1 = arith.constant 0 : i32
    return %arg0, %c0_i32, %c0_i32_0 : i32, i32, i32
  }
}

</mosaic_0001>

<bundles_post_ra>
// kernel: sample_cnn_forward.2
= control target key start
LH: loop header
LB: loop body
LE: loop exit
PB: predicated region body
PF: predicated region fallthrough
CT: control target
= control target key end

     0   :  { %12 = vsyncpa [#allocation3], 0  ;;  %s2107_s0 = inlined_call_operand.vmem [shape: f32[4,1,744], index: 0, kind: input, shape index: {}]   ;;  %s2108_s1 = inlined_call_operand.vmem [shape: f32[64,1], index: 1, kind: input, shape index: {}]   ;;  %s2109_s2 = inlined_call_operand.vmem [shape: f32[64,1], index: 2, kind: input, shape index: {}]   ;;  %s2110_s3 = inlined_call_operand.hbm [shape: f32[32,64], index: 3, kind: input, shape index: {}]   ;;  %s2111_s4 = inlined_call_operand.vmem [shape: f32[32,1], index: 4, kind: input, shape index: {}]   ;;  %s2112_s5 = inlined_call_operand.hbm [shape: f32[32,32], index: 5, kind: input, shape index: {}]   ;;  %s2113_s6 = inlined_call_operand.vmem [shape: f32[32,1], index: 6, kind: input, shape index: {}]   ;;  %s2114_s7 = inlined_call_operand.vmem [shape: f32[4,32,744], index: 7, kind: output, shape index: {}]  }
   0x1   :  { %13 = vsyncpa [#allocation5], 0  ;;  %s1607_s24 = smov 0  }
   0x2 LB: > { %s1613_s25 = sadd.s32 4294967295, %s1559_s24   ;;  %p1346_p0 = scmp.ge.s32.totalorder %s1559_s24, 1  ;;  %s1559_s24 = sphi %s1607_s24, %s19_s24  }
   0x3   : > { %p202_p1 = scmp.lt.s32.totalorder %s1559_s24, 5  ;;  %s1561_s26 = smov [#allocation2]  }
   0x4   : > { %s220_s27 = sshll.u32 %s1561_s26, 4  ;;  %p2115_p3 = scmp.eq.s32.totalorder %s1613_s25, 0  ;;  %s221_s27 = int_to_ptr.vmem [resolvable:$true] %s220_s27 }
   0x5   : > { %p1617_p2 = pnand %p1346_p0, %p202_p1  ;;  %s1562_s29 = smov [#allocation4]  }
   0x6   : > { %s236_s30 = sshll.u32 %s1562_s29, 4  ;;  %s1489_s11 = scalar_lea.hbm %s2110_s3, 512  ;;  %s1630_s30 = int_to_ptr.vmem [resolvable:$true] %s236_s30 }
   0x7   : > { %s2117_s28 = scalar_select %p1617_p2, 1, 0 }
   0x8   : > { %p1462_p4 = pneg %p1617_p2  ;;  %p1490_p6 = scmp.ne.s32.totalorder %s2110_s3, %s1489_s11 }
   0x9   : > { %p1496_p10 = scmp.lt.u32.totalorder %s1489_s11, %s2110_s3 }
   0xa   : > { %p1626_p5 = pnand %p2115_p3, %p1462_p4 }
   0xc   : > { %p1491_p7 = pneg %p1626_p5 }
   0xe   : > { %p1492_p8 = pnand %p1491_p7, %p1490_p6 }
  0x10   : > { %p1493_p9 = pneg %p1492_p8 }
  0x12   : > { %p1498_p11 = pnand %p1496_p10, %p1493_p9 }
  0x14   : > { %1501 = shalt.err (!%p1498_p11)
}
  0x15   : > { %s1502_s16 = scalar_lea.vmem %s221_s27, 512  ;;  %p1510_p1 = scmp.lt.s32.totalorder %s221_s27, %s221_s27 }
  0x16   : > { %p1503_p12 = scmp.ne.s32.totalorder %s221_s27, %s1502_s16  ;;  %p1511_p4 = scmp.lt.s32.totalorder %s1502_s16, %s1502_s16 }
  0x18   : > { %p1505_p13 = pnand %p1503_p12, %p1491_p7  ;;  %p1512_p3 = por %p1511_p4, %p1510_p1 }
  0x1a   : > { %p1506_p0 = pneg %p1505_p13 }
  0x1c   : > { %p1513_p2 = pnand %p1512_p3, %p1506_p0 }
  0x1e   : > { %1516 = shalt.err (!%p1513_p2)
}
  0x1f   : > { %s1563_s17 = smov 128   ;;  %s1564_s18 = smov 8  }
  0x20   : > { %1465 = dma.hbm_to_vmem [thread:$0]  (!%p1626_p5), %s2110_s3, 512, %s221_s27, [#allocation3], %s1563_s17, %s1563_s17, %s1564_s18  }
  0x21   : > { %s1517_s23 = scalar_lea.hbm %s2112_s5, 512 }
  0x22   : > { %p1518_p6 = scmp.ne.s32.totalorder %s2112_s5, %s1517_s23  ;;  %p1524_p8 = scmp.lt.u32.totalorder %s1517_s23, %s2112_s5 }
  0x24   : > { %p1520_p2 = pnand %p1518_p6, %p1491_p7 }
  0x26   : > { %p1521_p3 = pneg %p1520_p2 }
  0x28   : > { %p1526_p9 = pnand %p1524_p8, %p1521_p3 }
  0x2a   : > { %1529 = shalt.err (!%p1526_p9)
}
  0x2b   : > { %s1530_s27 = scalar_lea.vmem %s1630_s30, 512  ;;  %p1538_p13 = scmp.lt.s32.totalorder %s1630_s30, %s1630_s30 }
  0x2c   : > { %p1531_p10 = scmp.ne.s32.totalorder %s1630_s30, %s1530_s27  ;;  %p1539_p0 = scmp.lt.s32.totalorder %s1530_s27, %s1530_s27 }
  0x2e   : > { %p1533_p11 = pnand %p1531_p10, %p1491_p7  ;;  %p1540_p1 = por %p1539_p0, %p1538_p13 }
  0x30   : > { %p1534_p12 = pneg %p1533_p11 }
  0x32   : > { %p1541_p4 = pnand %p1540_p1, %p1534_p12 }
  0x34   : > { %1544 = shalt.err (!%p1541_p4)
}
  0x35   : > { %1468 = dma.hbm_to_vmem [thread:$0]  (!%p1626_p5), %s2112_s5, 512, %s1630_s30, [#allocation5], %s1563_s17, %s1563_s17, %s1564_s18  }
  0x36   : > { %p2119_p6 = scmp.ne.s32.totalorder %s2117_s28, 0 }
  0x37   : > { %p2120_p2 = scmp.eq.s32.totalorder (!%p2119_p6), %s1613_s25, 0 }
  0x38   : > { %262 = sbr.rel (%p2119_p6) target bundleno = 716 (0x2cc), region = 48 }
  0x3f   : > { %1550 = dma.done.wait (%p2120_p2), [#allocation3], 512   ;;  %p2121_p7 = pmov %p2120_p2 }
  0x40   : > { %p2122_p3 = pmov %p2120_p2 }
  0x41   : > { %1552 = vsyncadd (%p2121_p7), [#allocation3], 4294966784 }
  0x42   : > { %1554 = dma.done.wait (%p2122_p3), [#allocation5], 512   ;;  %p2123_p8 = pmov %p2120_p2 }
  0x43   : > { %v1565_v0 = vmov 0   ;;  %v434_v1 = vld [vmem:[%s2109_s2] sm:$0xff]  ;;  %v435_v3 = vld [vmem:[%s2109_s2 + $0x8] sm:$0xff]  ;;  %v310_v5 = vld [vmem:[%s2108_s1 + $0x18] sm:$0xff]  ;;  %v1566_v23 = vmov 0.0   ;;  %p297_p5 = scmp.lt.s32.totalorder %s1613_s25, 3  ;;  %v356_v26 = vlaneseq }
  0x44   : > { %1556 = vsyncadd (%p2123_p8), [#allocation5], 4294966784  ;;  %1488 = vset.pattern.permute.xlu1 %v1565_v0  ;;  %1487 = vset.pattern.permute.xlu0 %v1565_v0  ;;  %v307_v2 = vld [vmem:[%s2108_s1] sm:$0xff]  ;;  %v308_v4 = vld [vmem:[%s2108_s1 + $0x8] sm:$0xff]  ;;  %vm606_vm0 = vcmask 523264   ;;  %vm938_vm1 = vcmask 261120  }
  0x45   : > { %444 = vperm.xlu1 %1488, %v434_v1   ;;  %317 = vperm.xlu0 %1487, %v307_v2   ;;  %v309_v6 = vld [vmem:[%s2108_s1 + $0x10] sm:$0xff]  ;;  %v437_v7 = vld [vmem:[%s2109_s2 + $0x18] sm:$0xff]  ;;  %v312_v9 = vld [vmem:[%s2108_s1 + $0x28] sm:$0xff]  ;;  %s2125_s25 = smov (!%p297_p5, %s1613_s25), 3  ;;  %v357_v27 = vshrl.u32 %v356_v26, 7  ;;  %vm1247_vm2 = vcmask 850944  }
  0x46   : > { %v436_v8 = vld [vmem:[%s2109_s2 + $0x10] sm:$0xff]  ;;  %v311_v10 = vld [vmem:[%s2108_s1 + $0x20] sm:$0xff]  ;;  %v439_v11 = vld [vmem:[%s2109_s2 + $0x28] sm:$0xff]  ;;  %683 = vmatprep.mubr.f32.mxu0 %v1566_v23  ;;  %772 = vmatprep.mubr.f32.mxu1 %v1566_v23  ;;  %s1452_s16 = smul.u32 6, %s2125_s25 }
  0x47   : > { %v438_v12 = vld [vmem:[%s2109_s2 + $0x20] sm:$0xff]  ;;  %v314_v13 = vld [vmem:[%s2108_s1 + $0x38] sm:$0xff]  ;;  %v313_v14 = vld [vmem:[%s2108_s1 + $0x30] sm:$0xff]  ;;  %v374_v28 = vsub.s32 4, %v357_v27  ;;  %v362_v29 = vsub.s32 1, %v357_v27  ;;  %v370_v30 = vsub.s32 3, %v357_v27 }
  0x48   : > { %v441_v15 = vld [vmem:[%s2109_s2 + $0x38] sm:$0xff]  ;;  %v440_v16 = vld [vmem:[%s2109_s2 + $0x30] sm:$0xff]  ;;  %v583_v17 = vld [vmem:[%s2111_s4 + $0x8] sm:$0xff]  ;;  %s300_s19 = scalar_lea.vmem %s2107_s0, %s1452_s16  ;;  %v358_v31 = vsub.s32 0, %v357_v27  ;;  %v366_v33 = vsub.s32 2, %v357_v27  ;;  %v378_v34 = vsub.s32 5, %v357_v27 }
  0x49   : > { %449 = vperm.xlu1 %1488, %v435_v3   ;;  %322 = vperm.xlu0 %1487, %v308_v4   ;;  %v582_v18 = vld [vmem:[%s2111_s4] sm:$0xff]  ;;  %v585_v19 = vld [vmem:[%s2111_s4 + $0x18] sm:$0xff]  ;;  %v584_v20 = vld [vmem:[%s2111_s4 + $0x10] sm:$0xff]  ;;  %s1453_s20 = smul.u32 192, %s2125_s25 }
  0x4a   : > { %v915_v21 = vld [vmem:[%s2113_s6 + $0x8] sm:$0xff]  ;;  %v914_v22 = vld [vmem:[%s2113_s6] sm:$0xff]  ;;  %v917_v24 = vld [vmem:[%s2113_s6 + $0x18] sm:$0xff] }
  0x4b   : > { %v916_v25 = vld [vmem:[%s2113_s6 + $0x10] sm:$0xff]  ;;  %v306_v32 = vld [vmem:[%s300_s19] sm:$0x3f]  ;;  %s2053_s23 = scalar_lea.vmem %s2114_s7, %s1453_s20 }
  0x4c   : > { %v1771_v35 = vrot.slane %v306_v32, %v374_v28  ;;  %v1773_v36 = vrot.slane %v306_v32, %v362_v29  ;;  %v1775_v37 = vrot.slane %v306_v32, %v370_v30  ;;  %v1777_v38 = vrot.slane %v306_v32, %v358_v31 }
  0x4d   : > { %332 = vperm.xlu1 %1488, %v310_v5   ;;  %327 = vperm.xlu0 %1487, %v309_v6   ;;  %v1779_v39 = vrot.slane %v306_v32, %v366_v33  ;;  %v1781_v40 = vrot.slane %v306_v32, %v378_v34 }
  0x51   : > { %459 = vperm.xlu1 %1488, %v437_v7   ;;  %454 = vperm.xlu0 %1487, %v436_v8  }
  0x55   : > { %342 = vperm.xlu1 %1488, %v312_v9   ;;  %337 = vperm.xlu0 %1487, %v311_v10  }
  0x59   : > { %469 = vperm.xlu1 %1488, %v439_v11   ;;  %464 = vperm.xlu0 %1487, %v438_v12  }
  0x5d   : > { %352 = vperm.xlu1 %1488, %v314_v13   ;;  %347 = vperm.xlu0 %1487, %v313_v14  }
  0x61   : > { %479 = vperm.xlu1 %1488, %v441_v15   ;;  %474 = vperm.xlu0 %1487, %v440_v16  }
  0x65   : > { %593 = vperm.xlu1 %1488, %v583_v17   ;;  %588 = vperm.xlu0 %1487, %v582_v18  }
  0x69   : > { %603 = vperm.xlu1 %1488, %v585_v19   ;;  %598 = vperm.xlu0 %1487, %v584_v20  }
  0x6d   : > { %925 = vperm.xlu1 %1488, %v915_v21   ;;  %920 = vperm.xlu0 %1487, %v914_v22  }
  0x71   : > { %935 = vperm.xlu1 %1488, %v917_v24   ;;  %930 = vperm.xlu0 %1487, %v916_v25  }
  0xc4   : > { %v445_v41 = vpop.permute.xlu1 %444  ;;  %v318_v42 = vpop.permute.xlu0 %317 }
  0xc5   : > { %v390_v43 = vmul.f32 %v1771_v35, %v318_v42  ;;  %v387_v44 = vmul.f32 %v1773_v36, %v318_v42  ;;  %v389_v45 = vmul.f32 %v1775_v37, %v318_v42  ;;  %v386_v46 = vmul.f32 %v1777_v38, %v318_v42 }
  0xc6   : > { %v388_v47 = vmul.f32 %v1779_v39, %v318_v42  ;;  %v391_v48 = vmul.f32 %v1781_v40, %v318_v42 }
  0xc7   : > { %v483_v49 = vadd.f32 %v445_v41, %v387_v44  ;;  %v485_v50 = vadd.f32 %v445_v41, %v389_v45  ;;  %v482_v51 = vadd.f32 %v445_v41, %v386_v46  ;;  %v1794_v58 = vadd.f32 %v445_v41, %v390_v43 }
  0xc8   : > { %v1789_v52 = vpop.permute.xlu1 %449  ;;  %v323_v53 = vpop.permute.xlu0 %322  ;;  %v484_v54 = vadd.f32 %v445_v41, %v388_v47  ;;  %v1798_v62 = vadd.f32 %v445_v41, %v391_v48 }
  0xc9   : > { %v396_v55 = vmul.f32 %v1771_v35, %v323_v53  ;;  %v393_v56 = vmul.f32 %v1773_v36, %v323_v53  ;;  %v395_v57 = vmul.f32 %v1775_v37, %v323_v53  ;;  %v531_v59 = vmax.f32 %v483_v49, 0.0 }
  0xca   : > { %v392_v60 = vmul.f32 %v1777_v38, %v323_v53  ;;  %v394_v61 = vmul.f32 %v1779_v39, %v323_v53  ;;  %v533_v1 = vmax.f32 %v485_v50, 0.0  ;;  %v530_v2 = vmax.f32 %v482_v51, 0.0 }
  0xcb   : > { %v489_v63 = vadd.f32 %v1789_v52, %v393_v56  ;;  %v491_v0 = vadd.f32 %v1789_v52, %v395_v57  ;;  %v532_v7 = vmax.f32 %v484_v54, 0.0  ;;  %v1809_v8 = vmul.f32 %v1781_v40, %v323_v53 }
  0xcc   : > { %v1802_v3 = vpop.permute.xlu1 %332  ;;  %v1804_v4 = vpop.permute.xlu0 %327  ;;  %v488_v5 = vadd.f32 %v1789_v52, %v392_v60  ;;  %v490_v6 = vadd.f32 %v1789_v52, %v394_v61  ;;  %v1816_v12 = vadd.f32 %v1789_v52, %v396_v55  ;;  %v535_v34 = vmax.f32 %v1798_v62, 0.0 }
  0xcd   : > { %v1813_v9 = vmul.f32 %v1771_v35, %v1802_v3  ;;  %v537_v10 = vmax.f32 %v489_v63, 0.0  ;;  %v539_v11 = vmax.f32 %v491_v0, 0.0  ;;  %v399_v15 = vmul.f32 %v1773_v36, %v1804_v4 }
  0xce   : > { %v536_v13 = vmax.f32 %v488_v5, 0.0  ;;  %v538_v14 = vmax.f32 %v490_v6, 0.0  ;;  %v405_v16 = vmul.f32 %v1773_v36, %v1802_v3  ;;  %v401_v19 = vmul.f32 %v1775_v37, %v1804_v4 }
  0xcf   : > { %v1380_v17 = vpack.c.bf16 %v537_v10, %v531_v59  ;;  %v1396_v18 = vpack.c.bf16 %v539_v11, %v533_v1  ;;  %v407_v20 = vmul.f32 %v1775_v37, %v1802_v3  ;;  %v398_v26 = vmul.f32 %v1777_v38, %v1804_v4 }
  0xd0   : > { %v1826_v21 = vpop.permute.xlu1 %459  ;;  %v1828_v22 = vpop.permute.xlu0 %454  ;;  %v1382_v24 = vpack.c.bf16 %v536_v13, %v530_v2  ;;  %v1398_v25 = vpack.c.bf16 %v538_v14, %v532_v7  ;;  %v404_v27 = vmul.f32 %v1777_v38, %v1802_v3  ;;  %v400_v44 = vmul.f32 %v1779_v39, %v1804_v4 }
  0xd1   : > { %1381 = vmatprep.subr.bf16.mxu0 %v1380_v17  ;;  %1397 = vmatprep.subr.bf16.mxu1 %v1396_v18  ;;  %v495_v28 = vadd.f32 %v1828_v22, %v399_v15  ;;  %v501_v29 = vadd.f32 %v1826_v21, %v405_v16  ;;  %v497_v30 = vadd.f32 %v1828_v22, %v401_v19  ;;  %v534_v55 = vmax.f32 %v1794_v58, 0.0 }
  0xd2   : > { %1383 = vmatpush1.bf16.msra.mxu0 %v1382_v24  ;;  %1399 = vmatpush1.bf16.msra.mxu1 %v1398_v25  ;;  %v503_v31 = vadd.f32 %v1826_v21, %v407_v20  ;;  %v494_v32 = vadd.f32 %v1828_v22, %v398_v26  ;;  %v500_v33 = vadd.f32 %v1826_v21, %v404_v27 }
  0xd3   : > { %v543_v41 = vmax.f32 %v495_v28, 0.0  ;;  %v549_v42 = vmax.f32 %v501_v29, 0.0  ;;  %v545_v43 = vmax.f32 %v497_v30, 0.0  ;;  %v406_v50 = vmul.f32 %v1779_v39, %v1802_v3 }
  0xd4   : > { %v1843_v45 = vpop.permute.xlu1 %342  ;;  %v1845_v46 = vpop.permute.xlu0 %337  ;;  %v551_v47 = vmax.f32 %v503_v31, 0.0  ;;  %v542_v48 = vmax.f32 %v494_v32, 0.0  ;;  %v548_v49 = vmax.f32 %v500_v33, 0.0  ;;  %v1851_v51 = vmul.f32 %v1771_v35, %v1804_v4 }
  0xd5   : > { %v1384_v53 = vpack.c.bf16 %v549_v42, %v543_v41  ;;  %v496_v54 = vadd.f32 %v1828_v22, %v400_v44  ;;  %v502_v59 = vadd.f32 %v1826_v21, %v406_v50  ;;  %v411_v60 = vmul.f32 %v1773_v36, %v1845_v46 }
  0xd6   : > { %v1400_v56 = vpack.c.bf16 %v551_v47, %v545_v43  ;;  %v1386_v57 = vpack.c.bf16 %v548_v49, %v542_v48  ;;  %v417_v63 = vmul.f32 %v1773_v36, %v1843_v45  ;;  %v413_v0 = vmul.f32 %v1775_v37, %v1845_v46 }
  0xd7   : > { %1385 = vmatprep.subr.bf16.mxu0 %v1384_v53  ;;  %v544_v61 = vmax.f32 %v496_v54, 0.0  ;;  %v419_v1 = vmul.f32 %v1775_v37, %v1843_v45  ;;  %v550_v6 = vmax.f32 %v502_v59, 0.0  ;;  %v410_v7 = vmul.f32 %v1777_v38, %v1845_v46 }
  0xd8   : > { %1401 = vmatprep.subr.bf16.mxu1 %v1400_v56  ;;  %v1864_v2 = vpop.permute.xlu1 %469  ;;  %v1866_v5 = vpop.permute.xlu0 %464  ;;  %1387 = vmatpush1.bf16.msra.mxu0 %v1386_v57  ;;  %v416_v10 = vmul.f32 %v1777_v38, %v1843_v45  ;;  %v412_v11 = vmul.f32 %v1779_v39, %v1845_v46  ;;  %v418_v20 = vmul.f32 %v1779_v39, %v1843_v45  ;;  %v540_v57 = vmax.f32 %v1816_v12, 0.0 }
  0xd9   : > { %v507_v13 = vadd.f32 %v1866_v5, %v411_v60  ;;  %v513_v14 = vadd.f32 %v1864_v2, %v417_v63  ;;  %v509_v15 = vadd.f32 %v1866_v5, %v413_v0  ;;  %v515_v16 = vadd.f32 %v1864_v2, %v419_v1 }
  0xda   : > { %v1402_v17 = vpack.c.bf16 %v550_v6, %v544_v61  ;;  %v506_v18 = vadd.f32 %v1866_v5, %v410_v7  ;;  %v512_v19 = vadd.f32 %v1864_v2, %v416_v10  ;;  %v508_v32 = vadd.f32 %v1866_v5, %v412_v11 }
  0xdb   : > { %v555_v24 = vmax.f32 %v507_v13, 0.0  ;;  %v561_v25 = vmax.f32 %v513_v14, 0.0  ;;  %v557_v26 = vmax.f32 %v509_v15, 0.0  ;;  %v563_v27 = vmax.f32 %v515_v16, 0.0 }
  0xdc   : > { %1403 = vmatpush1.bf16.msra.mxu1 %v1402_v17  ;;  %v1882_v28 = vpop.permute.xlu1 %352  ;;  %v1884_v29 = vpop.permute.xlu0 %347  ;;  %v554_v30 = vmax.f32 %v506_v18, 0.0  ;;  %v560_v31 = vmax.f32 %v512_v19, 0.0  ;;  %v514_v33 = vadd.f32 %v1864_v2, %v418_v20  ;;  %v1890_v41 = vmul.f32 %v1771_v35, %v1843_v45 }
  0xdd   : > { %v1894_v42 = vmul.f32 %v1771_v35, %v1845_v46  ;;  %v1388_v43 = vpack.c.bf16 %v561_v25, %v555_v24  ;;  %v1404_v44 = vpack.c.bf16 %v563_v27, %v557_v26  ;;  %v556_v48 = vmax.f32 %v508_v32, 0.0 }
  0xde   : > { %v1390_v47 = vpack.c.bf16 %v560_v31, %v554_v30  ;;  %v562_v49 = vmax.f32 %v514_v33, 0.0  ;;  %v423_v50 = vmul.f32 %v1773_v36, %v1884_v29  ;;  %v429_v53 = vmul.f32 %v1773_v36, %v1882_v28 }
  0xdf   : > { %1389 = vmatprep.subr.bf16.mxu0 %v1388_v43  ;;  %1405 = vmatprep.subr.bf16.mxu1 %v1404_v44  ;;  %v425_v54 = vmul.f32 %v1775_v37, %v1884_v29  ;;  %v431_v56 = vmul.f32 %v1775_v37, %v1882_v28  ;;  %v422_v63 = vmul.f32 %v1777_v38, %v1884_v29 }
  0xe0   : > { %v1905_v59 = vpop.permute.xlu1 %479  ;;  %v1907_v60 = vpop.permute.xlu0 %474  ;;  %1391 = vmatpush1.bf16.msra.mxu0 %v1390_v47  ;;  %v1406_v61 = vpack.c.bf16 %v562_v49, %v556_v48  ;;  %v428_v36 = vmul.f32 %v1777_v38, %v1882_v28  ;;  %v424_v0 = vmul.f32 %v1779_v39, %v1884_v29  ;;  %v430_v38 = vmul.f32 %v1779_v39, %v1882_v28 }
  0xe1   : > { %v519_v37 = vadd.f32 %v1907_v60, %v423_v50  ;;  %v525_v12 = vadd.f32 %v1905_v59, %v429_v53  ;;  %v521_v1 = vadd.f32 %v1907_v60, %v425_v54  ;;  %v527_v6 = vadd.f32 %v1905_v59, %v431_v56 }
  0xe2   : > { %1407 = vmatpush1.bf16.msra.mxu1 %v1406_v61  ;;  %v518_v7 = vadd.f32 %v1907_v60, %v422_v63  ;;  %v524_v10 = vadd.f32 %v1905_v59, %v428_v36  ;;  %v520_v11 = vadd.f32 %v1907_v60, %v424_v0  ;;  %v526_v19 = vadd.f32 %v1905_v59, %v430_v38  ;;  %v580_v36 = vld [vmem:[#allocation2 + $0x10] sm:$0xff] }
  0xe3   : > { %v567_v13 = vmax.f32 %v519_v37, 0.0  ;;  %v573_v14 = vmax.f32 %v525_v12, 0.0  ;;  %v569_v15 = vmax.f32 %v521_v1, 0.0  ;;  %v575_v16 = vmax.f32 %v527_v6, 0.0 }
  0xe4   : > { %v566_v17 = vmax.f32 %v518_v7, 0.0  ;;  %v572_v18 = vmax.f32 %v524_v10, 0.0  ;;  %v568_v20 = vmax.f32 %v520_v11, 0.0  ;;  %v493_v26 = vadd.f32 %v1789_v52, %v1809_v8  ;;  %v1992_v38 = vpop.permute.xlu0 %588 }
  0xe5   : > { %v1392_v24 = vpack.c.bf16 %v573_v14, %v567_v13  ;;  %v1408_v25 = vpack.c.bf16 %v575_v16, %v569_v15  ;;  %v1414_v27 = vpack.c.bf16 %v540_v57, %v534_v55  ;;  %v574_v30 = vmax.f32 %v526_v19, 0.0  ;;  %v1939_v55 = vld [vmem:[#allocation2] sm:$0xff]  ;;  %v1995_v15 = vpop.permute.xlu1 %593 }
  0xe6   : > { %v1394_v39 = vpack.c.bf16 %v572_v18, %v566_v17  ;;  %v403_v31 = vmul.f32 %v1781_v40, %v1804_v4  ;;  %v409_v32 = vmul.f32 %v1781_v40, %v1802_v3  ;;  %v541_v33 = vmax.f32 %v493_v26, 0.0 }
  0xe7   : > { %1393 = vmatprep.subr.bf16.mxu0 %v1392_v24  ;;  %1409 = vmatprep.subr.bf16.mxu1 %v1408_v25  ;;  %v498_v43 = vadd.f32 %v1828_v22, %v1851_v51  ;;  %v504_v52 = vadd.f32 %v1826_v21, %v1813_v9  ;;  %v415_v58 = vmul.f32 %v1781_v40, %v1845_v46 }
  0xe8   : > { %1395 = vmatpush1.bf16.msra.mxu0 %v1394_v39  ;;  %v1410_v8 = vpack.c.bf16 %v574_v30, %v568_v20  ;;  %v499_v4 = vadd.f32 %v1828_v22, %v403_v31  ;;  %v505_v3 = vadd.f32 %v1826_v21, %v409_v32  ;;  %v421_v44 = vmul.f32 %v1781_v40, %v1843_v45 }
  0xe9   : > { %v1412_v51 = vpack.c.bf16 %v541_v33, %v535_v34  ;;  %v546_v47 = vmax.f32 %v498_v43, 0.0  ;;  %v552_v48 = vmax.f32 %v504_v52, 0.0  ;;  %v511_v9 = vadd.f32 %v1866_v5, %v415_v58 }
  0xea   : > { %1411 = vmatpush1.bf16.msra.mxu1 %v1410_v8  ;;  %v547_v46 = vmax.f32 %v499_v4, 0.0  ;;  %v553_v49 = vmax.f32 %v505_v3, 0.0  ;;  %v517_v50 = vadd.f32 %v1864_v2, %v421_v44  ;;  %v510_v22 = vadd.f32 %v1866_v5, %v1894_v42  ;;  %v579_v5 = vld [vmem:[#allocation2 + $0x8] sm:$0xff]  ;;  %v2004_v3 = vpop.permute.xlu0 %598 }
  0xeb   : > { %v432_v21 = vmul.f32 %v1771_v35, %v1882_v28  ;;  %1413 = vmatprep.subr.bf16.mxu0 %v1412_v51  ;;  %1354 = vmatmul.mubr.msk.f32.vlgmr.msra.gmra.mrb[0].mxu0 %vm606_vm0, %v1939_v55  ;;  %v559_v62 = vmax.f32 %v511_v9, 0.0  ;;  %v516_v34 = vadd.f32 %v1864_v2, %v1890_v41  ;;  %v427_v45 = vmul.f32 %v1781_v40, %v1884_v29 }
  0xec   : > { %v426_v53 = vmul.f32 %v1771_v35, %v1884_v29  ;;  %1415 = vmatpush1.bf16.msra.mxu0 %v1414_v27  ;;  %v1416_v54 = vpack.c.bf16 %v553_v49, %v547_v46  ;;  %689 = vmatprep.mubr.f32.mxu0 %v1566_v23  ;;  %v565_v42 = vmax.f32 %v517_v50, 0.0  ;;  %v433_v56 = vmul.f32 %v1781_v40, %v1882_v28  ;;  %v2007_v50 = vpop.permute.xlu1 %603 }
  0xed   : > { %1358 = vmatmul.mubr.msk.f32.vlgmr.msra.gmra.mrb[0].mxu1 %vm606_vm0, %v1939_v55  ;;  %v1418_v57 = vpack.c.bf16 %v552_v48, %v546_v47  ;;  %v558_v2 = vmax.f32 %v510_v22, 0.0  ;;  %v523_v41 = vadd.f32 %v1907_v60, %v427_v45  ;;  %v564_v35 = vmax.f32 %v516_v34, 0.0 }
  0xee   : > { %1417 = vmatprep.subr.bf16.mxu0 %v1416_v54  ;;  %778 = vmatprep.mubr.f32.mxu1 %v1566_v23  ;;  %v529_v29 = vadd.f32 %v1905_v59, %v433_v56  ;;  %v522_v61 = vadd.f32 %v1907_v60, %v426_v53  ;;  %v528_v63 = vadd.f32 %v1905_v59, %v432_v21  ;;  %v581_v60 = vld [vmem:[#allocation2 + $0x18] sm:$0xff] }
  0xef   : > { %1355 = vmatmul.mubr.msk.f32.gmra.mrb[2].mxu0 %vm606_vm0, %v579_v5  ;;  %v1420_v40 = vpack.c.bf16 %v565_v42, %v559_v62  ;;  %v571_v28 = vmax.f32 %v523_v41, 0.0  ;;  %v1422_v37 = vpack.c.bf16 %v564_v35, %v558_v2 }
  0xf0   : > { %1419 = vmatpush1.bf16.msra.mxu0 %v1418_v57  ;;  %695 = vmatprep.mubr.f32.mxu0 %v1566_v23  ;;  %v577_v0 = vmax.f32 %v529_v29, 0.0  ;;  %v570_v12 = vmax.f32 %v522_v61, 0.0  ;;  %v576_v1 = vmax.f32 %v528_v63, 0.0 }
  0xf1   : > { %1359 = vmatmul.mubr.msk.f32.gmra.mrb[2].mxu1 %vm606_vm0, %v579_v5  ;;  %1421 = vmatprep.subr.bf16.mxu0 %v1420_v40 }
  0xf2   : > { %784 = vmatprep.mubr.f32.mxu1 %v1566_v23  ;;  %v1424_v59 = vpack.c.bf16 %v577_v0, %v571_v28  ;;  %v1426_v6 = vpack.c.bf16 %v576_v1, %v570_v12 }
  0xf3   : > { %1356 = vmatmul.mubr.msk.f32.gmra.mrb[4].mxu0 %vm606_vm0, %v580_v36 }
  0xf4   : > { %1423 = vmatpush1.bf16.msra.mxu0 %v1422_v37  ;;  %701 = vmatprep.mubr.f32.mxu0 %v1566_v23 }
  0xf5   : > { %1360 = vmatmul.mubr.msk.f32.gmra.mrb[4].mxu1 %vm606_vm0, %v580_v36  ;;  %1425 = vmatprep.subr.bf16.mxu0 %v1424_v59 }
  0xf6   : > { %790 = vmatprep.mubr.f32.mxu1 %v1566_v23 }
  0xf7   : > { %1357 = vmatmul.mubr.msk.f32.gmra.mrb[6].mxu0 %vm606_vm0, %v581_v60 }
  0xf8   : > { %1427 = vmatpush1.bf16.msra.mxu0 %v1426_v6  ;;  %861 = vmatprep.mubr.f32.mxu0 %v1566_v23 }
  0xf9   : > { %1361 = vmatmul.mubr.msk.f32.gmra.mrb[6].mxu1 %vm606_vm0, %v581_v60 }
  0xfa   : > { %1015 = vmatprep.mubr.f32.mxu1 %v1566_v23 }
  0xfb   : > { %1362 = vmatmul.mubr.msk.f32.vlgmr.msra.gmra.mrb[8].mxu0 %vm606_vm0, %v1939_v55 }
  0xfc   : > { %867 = vmatprep.mubr.f32.mxu0 %v1566_v23 }
  0xff   : > { %1363 = vmatmul.mubr.msk.f32.gmra.mrb[10].mxu0 %vm606_vm0, %v579_v5 }
 0x100   : > { %873 = vmatprep.mubr.f32.mxu0 %v1566_v23 }
 0x103   : > { %1364 = vmatmul.mubr.msk.f32.gmra.mrb[12].mxu0 %vm606_vm0, %v580_v36 }
 0x104   : > { %879 = vmatprep.mubr.f32.mxu0 %v1566_v23 }
 0x107   : > { %1365 = vmatmul.mubr.msk.f32.gmra.mrb[14].mxu0 %vm606_vm0, %v581_v60 }
 0x108   : > { %1104 = vmatprep.mubr.f32.mxu0 %v1566_v23 }
 0x1be   : > { %v685_v7 = vpop.f32.mrb[0].mxu0 }
 0x1bf   : > { %v687_v10 = vpop.f32.mrb[1].mxu0  ;;  %v686_v13 = vadd.f32 %v685_v7, %v1992_v38 }
 0x1c0   : > { %v774_v11 = vpop.f32.mrb[0].mxu1  ;;  %v688_v16 = vadd.f32 %v687_v10, %v1992_v38 }
 0x1c1   : > { %v776_v14 = vpop.f32.mrb[1].mxu1  ;;  %v775_v18 = vadd.f32 %v774_v11, %v1992_v38  ;;  %v886_v27 = vmax.f32 %v686_v13, 0.0 }
 0x1c2   : > { %v691_v17 = vpop.f32.mrb[2].mxu0  ;;  %v777_v24 = vadd.f32 %v776_v14, %v1992_v38  ;;  %v887_v32 = vmax.f32 %v688_v16, 0.0  ;;  %v910_v14 = vld [vmem:[#allocation4] sm:$0xff] }
 0x1c3   : > { %v692_v19 = vadd.f32 %v691_v17, %v1995_v15  ;;  %v693_v20 = vpop.f32.mrb[3].mxu0  ;;  %v888_v58 = vmax.f32 %v775_v18, 0.0 }
 0x1c4   : > { %v780_v25 = vpop.f32.mrb[2].mxu1  ;;  %v694_v26 = vadd.f32 %v693_v20, %v1995_v15  ;;  %v889_v44 = vmax.f32 %v777_v24, 0.0 }
 0x1c5   : > { %v892_v39 = vmax.f32 %v692_v19, 0.0  ;;  %v781_v30 = vadd.f32 %v780_v25, %v1995_v15  ;;  %v782_v31 = vpop.f32.mrb[3].mxu1 }
 0x1c6   : > { %v893_v33 = vmax.f32 %v694_v26, 0.0  ;;  %v783_v43 = vadd.f32 %v782_v31, %v1995_v15  ;;  %v697_v52 = vpop.f32.mrb[4].mxu0  ;;  %v911_v26 = vld [vmem:[#allocation4 + $0x8] sm:$0xff] }
 0x1c7   : > { %v1430_v8 = vpack.c.bf16 %v892_v39, %v886_v27  ;;  %v894_v55 = vmax.f32 %v781_v30, 0.0  ;;  %v699_v4 = vpop.f32.mrb[5].mxu0  ;;  %v698_v46 = vadd.f32 %v697_v52, %v2004_v3 }
 0x1c8   : > { %v1428_v51 = vpack.c.bf16 %v893_v33, %v887_v32  ;;  %v895_v47 = vmax.f32 %v783_v43, 0.0  ;;  %v786_v48 = vpop.f32.mrb[4].mxu1  ;;  %v700_v21 = vadd.f32 %v699_v4, %v2004_v3  ;;  %v912_v33 = vld [vmem:[#allocation4 + $0x10] sm:$0xff] }
 0x1c9   : > { %v1438_v9 = vpack.c.bf16 %v894_v55, %v888_v58  ;;  %v788_v49 = vpop.f32.mrb[5].mxu1  ;;  %v787_v34 = vadd.f32 %v786_v48, %v2004_v3  ;;  %v898_v56 = vmax.f32 %v698_v46, 0.0 }
 0x1ca   : > { %v1436_v22 = vpack.c.bf16 %v895_v47, %v889_v44  ;;  %v703_v62 = vpop.f32.mrb[6].mxu0  ;;  %1429 = vmatprep.subr.bf16.mxu1 %v1428_v51  ;;  %v789_v54 = vadd.f32 %v788_v49, %v2004_v3  ;;  %v899_v35 = vmax.f32 %v700_v21, 0.0  ;;  %v2047_v51 = vpop.permute.xlu0 %920 }
 0x1cb   : > { %v704_v45 = vadd.f32 %v703_v62, %v2007_v50  ;;  %v705_v53 = vpop.f32.mrb[7].mxu0  ;;  %1431 = vmatpush1.bf16.msra.mxu1 %v1430_v8  ;;  %v900_v40 = vmax.f32 %v787_v34, 0.0  ;;  %v2057_v21 = vpop.permute.xlu1 %925 }
 0x1cc   : > { %v792_v5 = vpop.f32.mrb[6].mxu1  ;;  %1437 = vmatprep.subr.bf16.mxu0 %v1436_v22  ;;  %v706_v42 = vadd.f32 %v705_v53, %v2007_v50  ;;  %v901_v37 = vmax.f32 %v789_v54, 0.0 }
 0x1cd   : > { %v904_v57 = vmax.f32 %v704_v45, 0.0  ;;  %v793_v2 = vadd.f32 %v792_v5, %v2007_v50  ;;  %v794_v41 = vpop.f32.mrb[7].mxu1  ;;  %1439 = vmatpush1.bf16.msra.mxu0 %v1438_v9 }
 0x1ce   : > { %v905_v29 = vmax.f32 %v706_v42, 0.0  ;;  %v795_v61 = vadd.f32 %v794_v41, %v2007_v50  ;;  %v863_v63 = vpop.f32.mrb[8].mxu0 }
 0x1cf   : > { %v1434_v28 = vpack.c.bf16 %v904_v57, %v898_v56  ;;  %v906_v36 = vmax.f32 %v793_v2, 0.0  ;;  %v865_v0 = vpop.f32.mrb[9].mxu0  ;;  %v864_v60 = vadd.f32 %v863_v63, %v1992_v38 }
 0x1d0   : > { %v1432_v12 = vpack.c.bf16 %v905_v29, %v899_v35  ;;  %v907_v1 = vmax.f32 %v795_v61, 0.0  ;;  %v866_v7 = vadd.f32 %v865_v0, %v1992_v38  ;;  %v2066_v29 = vpop.permute.xlu0 %930 }
 0x1d1   : > { %v1442_v59 = vpack.c.bf16 %v906_v36, %v900_v40  ;;  %v890_v17 = vmax.f32 %v864_v60, 0.0 }
 0x1d2   : > { %v1440_v6 = vpack.c.bf16 %v907_v1, %v901_v37  ;;  %v869_v10 = vpop.f32.mrb[10].mxu0  ;;  %1433 = vmatprep.subr.bf16.mxu1 %v1432_v12  ;;  %v891_v19 = vmax.f32 %v866_v7, 0.0  ;;  %v936_v7 = vpop.permute.xlu1 %935 }
 0x1d3   : > { %v870_v11 = vadd.f32 %v869_v10, %v1995_v15  ;;  %v871_v13 = vpop.f32.mrb[11].mxu0  ;;  %1435 = vmatpush1.bf16.msra.mxu1 %v1434_v28 }
 0x1d4   : > { %1441 = vmatprep.subr.bf16.mxu0 %v1440_v6  ;;  %v872_v16 = vadd.f32 %v871_v13, %v1995_v15 }
 0x1d5   : > { %v896_v18 = vmax.f32 %v870_v11, 0.0  ;;  %1443 = vmatpush1.bf16.msra.mxu0 %v1442_v59 }
 0x1d6   : > { %v897_v20 = vmax.f32 %v872_v16, 0.0  ;;  %v875_v24 = vpop.f32.mrb[12].mxu0  ;;  %1366 = vmatmul.mubr.msk.f32.vlgmr.msra.gmra.mrb[8].mxu1 %vm938_vm1, %v910_v14 }
 0x1d7   : > { %v1446_v38 = vpack.c.bf16 %v896_v18, %v890_v17  ;;  %v877_v25 = vpop.f32.mrb[13].mxu0  ;;  %1021 = vmatprep.mubr.f32.mxu1 %v1566_v23  ;;  %v876_v39 = vadd.f32 %v875_v24, %v2004_v3 }
 0x1d8   : > { %v1444_v27 = vpack.c.bf16 %v897_v20, %v891_v19  ;;  %1370 = vmatmul.mubr.msk.f32.vlgmr.msra.gmra.mrb[16].mxu0 %vm938_vm1, %v910_v14  ;;  %v878_v15 = vadd.f32 %v877_v25, %v2004_v3  ;;  %v913_v3 = vld [vmem:[#allocation4 + $0x18] sm:$0xff] }
 0x1d9   : > { %1110 = vmatprep.mubr.f32.mxu0 %v1566_v23  ;;  %v902_v52 = vmax.f32 %v876_v39, 0.0 }
 0x1da   : > { %v881_v30 = vpop.f32.mrb[14].mxu0  ;;  %1367 = vmatmul.mubr.msk.f32.gmra.mrb[10].mxu1 %vm938_vm1, %v911_v26  ;;  %1445 = vmatprep.subr.bf16.mxu1 %v1444_v27  ;;  %v903_v8 = vmax.f32 %v878_v15, 0.0 }
 0x1db   : > { %v882_v31 = vadd.f32 %v881_v30, %v2007_v50  ;;  %v883_v32 = vpop.f32.mrb[15].mxu0  ;;  %1447 = vmatpush1.bf16.msra.mxu1 %v1446_v38  ;;  %1027 = vmatprep.mubr.f32.mxu1 %v1566_v23 }
 0x1dc   : > { %1371 = vmatmul.mubr.msk.f32.gmra.mrb[18].mxu0 %vm938_vm1, %v911_v26  ;;  %v884_v43 = vadd.f32 %v883_v32, %v2007_v50 }
 0x1dd   : > { %v908_v58 = vmax.f32 %v882_v31, 0.0  ;;  %1116 = vmatprep.mubr.f32.mxu0 %v1566_v23 }
 0x1de   : > { %v909_v55 = vmax.f32 %v884_v43, 0.0  ;;  %1368 = vmatmul.mubr.msk.f32.gmra.mrb[12].mxu1 %vm938_vm1, %v912_v33 }
 0x1df   : > { %v1450_v4 = vpack.c.bf16 %v908_v58, %v902_v52  ;;  %1033 = vmatprep.mubr.f32.mxu1 %v1566_v23 }
 0x1e0   : > { %v1448_v44 = vpack.c.bf16 %v909_v55, %v903_v8  ;;  %1372 = vmatmul.mubr.msk.f32.gmra.mrb[20].mxu0 %vm938_vm1, %v912_v33 }
 0x1e1   : > { %1122 = vmatprep.mubr.f32.mxu0 %v1566_v23 }
 0x1e2   : > { %1369 = vmatmul.mubr.msk.f32.gmra.mrb[14].mxu1 %vm938_vm1, %v913_v3  ;;  %1449 = vmatprep.subr.bf16.mxu1 %v1448_v44 }
 0x1e3   : > { %1451 = vmatpush1.bf16.msra.mxu1 %v1450_v4  ;;  %1193 = vmatprep.mubr.f32.mxu1 %v1566_v23 }
 0x1e4   : > { %1373 = vmatmul.mubr.msk.f32.gmra.mrb[22].mxu0 %vm938_vm1, %v913_v3 }
 0x1e6   : > { %1374 = vmatmul.mubr.msk.f32.vlgmr.msra.gmra.mrb[16].mxu1 %vm938_vm1, %v910_v14 }
 0x1e7   : > { %1199 = vmatprep.mubr.f32.mxu1 %v1566_v23 }
 0x1ea   : > { %1375 = vmatmul.mubr.msk.f32.gmra.mrb[18].mxu1 %vm938_vm1, %v911_v26 }
 0x1eb   : > { %1205 = vmatprep.mubr.f32.mxu1 %v1566_v23 }
 0x1ee   : > { %1376 = vmatmul.mubr.msk.f32.gmra.mrb[20].mxu1 %vm938_vm1, %v912_v33 }
 0x1ef   : > { %1211 = vmatprep.mubr.f32.mxu1 %v1566_v23 }
 0x1f2   : > { %1377 = vmatmul.mubr.msk.f32.gmra.mrb[22].mxu1 %vm938_vm1, %v913_v3 }
 0x2a9   : > { %v1017_v47 = vpop.f32.mrb[8].mxu1 }
 0x2aa   : > { %v1018_v48 = vadd.f32 %v1017_v47, %v2047_v51  ;;  %v1019_v9 = vpop.f32.mrb[9].mxu1 }
 0x2ab   : > { %v1106_v46 = vpop.f32.mrb[16].mxu0  ;;  %v1020_v49 = vadd.f32 %v1019_v9, %v2047_v51 }
 0x2ac   : > { %v1218_v23 = vmax.f32 %v1018_v48, 0.0  ;;  %v1107_v50 = vadd.f32 %v1106_v46, %v2047_v51  ;;  %v1108_v22 = vpop.f32.mrb[17].mxu0 }
 0x2ad   : > { %v1219_v62 = vmax.f32 %v1020_v49, 0.0  ;;  %v1109_v34 = vadd.f32 %v1108_v22, %v2047_v51  ;;  %v1023_v45 = vpop.f32.mrb[10].mxu1 }
 0x2ae   : > { %1242 = vst [vmem:[%s2053_s23] sm:$0xff] %v1218_v23  ;;  %v1220_v53 = vmax.f32 %v1107_v50, 0.0  ;;  %v1024_v54 = vadd.f32 %v1023_v45, %v2057_v21  ;;  %v1025_v5 = vpop.f32.mrb[11].mxu1 }
 0x2af   : > { %1243 = vst [vmem:[%s2053_s23 + $0x8] sm:$0xff] %v1219_v62  ;;  %v1221_v42 = vmax.f32 %v1109_v34, 0.0  ;;  %v1112_v56 = vpop.f32.mrb[18].mxu0  ;;  %v1026_v57 = vadd.f32 %v1025_v5, %v2057_v21 }
 0x2b0   : > { %1244 = vst [vmem:[%s2053_s23 + $0x10] sm:$0xff] %v1220_v53  ;;  %v1224_v2 = vmax.f32 %v1024_v54, 0.0  ;;  %v1113_v41 = vadd.f32 %v1112_v56, %v2057_v21  ;;  %v1114_v35 = vpop.f32.mrb[19].mxu0 }
 0x2b1   : > { %1245 = vst [vmem:[%s2053_s23 + $0x18] sm:$0xff] %v1221_v42  ;;  %v1225_v61 = vmax.f32 %v1026_v57, 0.0  ;;  %v1115_v63 = vadd.f32 %v1114_v35, %v2057_v21  ;;  %v1029_v40 = vpop.f32.mrb[12].mxu1 }
 0x2b2   : > { %1249 = vst [vmem:[%s2053_s23 + $0x30] sm:$0xff] %v1224_v2  ;;  %v1226_v28 = vmax.f32 %v1113_v41, 0.0  ;;  %v1030_v36 = vadd.f32 %v1029_v40, %v2066_v29  ;;  %v1031_v0 = vpop.f32.mrb[13].mxu1 }
 0x2b3   : > { %1250 = vst [vmem:[%s2053_s23 + $0x38] sm:$0xff] %v1225_v61  ;;  %v1227_v37 = vmax.f32 %v1115_v63, 0.0  ;;  %v1118_v12 = vpop.f32.mrb[20].mxu0  ;;  %v1032_v1 = vadd.f32 %v1031_v0, %v2066_v29 }
 0x2b4   : > { %1251 = vst [vmem:[%s2053_s23 + $0x40] sm:$0xff] %v1226_v28  ;;  %v1230_v59 = vmax.f32 %v1030_v36, 0.0  ;;  %v1119_v60 = vadd.f32 %v1118_v12, %v2066_v29  ;;  %v1120_v6 = vpop.f32.mrb[21].mxu0 }
 0x2b5   : > { %1252 = vst [vmem:[%s2053_s23 + $0x48] sm:$0xff] %v1227_v37  ;;  %v1231_v10 = vmax.f32 %v1032_v1, 0.0  ;;  %v1121_v11 = vadd.f32 %v1120_v6, %v2066_v29  ;;  %v1035_v13 = vpop.f32.mrb[14].mxu1 }
 0x2b6   : > { %1255 = vst [vmem:[%s2053_s23 + $0x60] sm:$0xff] %v1230_v59  ;;  %v1232_v14 = vmax.f32 %v1119_v60, 0.0  ;;  %v1036_v16 = vadd.f32 %v1035_v13, %v936_v7  ;;  %v1037_v17 = vpop.f32.mrb[15].mxu1 }
 0x2b7   : > { %1256 = vst [vmem:[%s2053_s23 + $0x68] sm:$0xff] %v1231_v10  ;;  %v1233_v18 = vmax.f32 %v1121_v11, 0.0  ;;  %v1124_v19 = vpop.f32.mrb[22].mxu0  ;;  %v1038_v20 = vadd.f32 %v1037_v17, %v936_v7 }
 0x2b8   : > { %1257 = vst [vmem:[%s2053_s23 + $0x70] sm:$0xff] %v1232_v14  ;;  %v1236_v24 = vmax.f32 %v1036_v16, 0.0  ;;  %v1125_v38 = vadd.f32 %v1124_v19, %v936_v7  ;;  %v1126_v25 = vpop.f32.mrb[23].mxu0 }
 0x2b9   : > { %1258 = vst [vmem:[%s2053_s23 + $0x78] sm:$0xff] %v1233_v18  ;;  %v1237_v26 = vmax.f32 %v1038_v20, 0.0  ;;  %v1127_v27 = vadd.f32 %v1126_v25, %v936_v7  ;;  %v1195_v39 = vpop.f32.mrb[16].mxu1 }
 0x2ba   : > { %1261 = vst [vmem:[%s2053_s23 + $0x90] sm:$0xff] %v1236_v24  ;;  %v1238_v15 = vmax.f32 %v1125_v38, 0.0  ;;  %v1196_v30 = vadd.f32 %v1195_v39, %v2047_v51  ;;  %v1197_v31 = vpop.f32.mrb[17].mxu1 }
 0x2bb   : > { %1262 = vst [vmem:[%s2053_s23 + $0x98] sm:$0xff] %v1237_v26  ;;  %v1239_v32 = vmax.f32 %v1127_v27, 0.0  ;;  %v1198_v33 = vadd.f32 %v1197_v31, %v2047_v51 }
 0x2bc   : > { %1263 = vst [vmem:[%s2053_s23 + $0xa0] sm:$0xff] %v1238_v15  ;;  %v1222_v43 = vmax.f32 %v1196_v30, 0.0 }
 0x2bd   : > { %1264 = vst [vmem:[%s2053_s23 + $0xa8] sm:$0xff] %v1239_v32  ;;  %v1223_v52 = vmax.f32 %v1198_v33, 0.0  ;;  %v1201_v58 = vpop.f32.mrb[18].mxu1 }
 0x2be   : > { %1246 = vst [vmem:[%s2053_s23 + $0x20] sm:$0xff] %v1222_v43  ;;  %v1202_v8 = vadd.f32 %v1201_v58, %v2057_v21  ;;  %v1203_v55 = vpop.f32.mrb[19].mxu1 }
 0x2bf   : > { %1248 = vst.msk [vmem:[%s2053_s23 + $0x28] sm:$0xff] %vm1247_vm2, %v1223_v52  ;;  %v1204_v4 = vadd.f32 %v1203_v55, %v2057_v21 }
 0x2c0   : > { %v1228_v3 = vmax.f32 %v1202_v8, 0.0 }
 0x2c1   : > { %v1229_v44 = vmax.f32 %v1204_v4, 0.0  ;;  %v1207_v51 = vpop.f32.mrb[20].mxu1 }
 0x2c2   : > { %1253 = vst [vmem:[%s2053_s23 + $0x50] sm:$0xff] %v1228_v3  ;;  %v1208_v47 = vadd.f32 %v1207_v51, %v2066_v29  ;;  %v1209_v48 = vpop.f32.mrb[21].mxu1 }
 0x2c3   : > { %1254 = vst.msk [vmem:[%s2053_s23 + $0x58] sm:$0xff] %vm1247_vm2, %v1229_v44  ;;  %v1210_v9 = vadd.f32 %v1209_v48, %v2066_v29 }
 0x2c4   : > { %v1234_v46 = vmax.f32 %v1208_v47, 0.0 }
 0x2c5   : > { %v1235_v49 = vmax.f32 %v1210_v9, 0.0  ;;  %v1213_v23 = vpop.f32.mrb[22].mxu1 }
 0x2c6   : > { %1259 = vst [vmem:[%s2053_s23 + $0x80] sm:$0xff] %v1234_v46  ;;  %v1214_v50 = vadd.f32 %v1213_v23, %v936_v7  ;;  %v1215_v22 = vpop.f32.mrb[23].mxu1 }
 0x2c7   : > { %1260 = vst.msk [vmem:[%s2053_s23 + $0x88] sm:$0xff] %vm1247_vm2, %v1235_v49  ;;  %v1216_v21 = vadd.f32 %v1215_v22, %v936_v7 }
 0x2c8   : > { %v1240_v62 = vmax.f32 %v1214_v50, 0.0 }
 0x2c9   : > { %v1241_v34 = vmax.f32 %v1216_v21, 0.0 }
 0x2ca   : > { %1265 = vst [vmem:[%s2053_s23 + $0xb0] sm:$0xff] %v1240_v62 }
 0x2cb   : > { %1266 = vst.msk [vmem:[%s2053_s23 + $0xb8] sm:$0xff] %vm1247_vm2, %v1241_v34 }
 0x2cc PF: > { %s19_s24 = sadd.s32 1, %s1559_s24  }
 0x2cd   : > { %p16_p9 = scmp.ge.s32.totalorder %s19_s24, 6  }
 0x2cf   :  { %18 = sbr.rel (!%p16_p9) target bundleno = 2 (0x2), region = 87 }
 0x2d6   :  { %1288 = vsyncpa [#allocation3], 1 }
 0x2d7   :  { %1290 = vsyncpa [#allocation3 + $0x1], 1 }
 0x2d8   :  { %1291 = vsyncpa [#allocation5], 1 }

// kernel: sample_cnn_forward.3
= control target key start
LH: loop header
LB: loop body
LE: loop exit
PB: predicated region body
PF: predicated region fallthrough
CT: control target
= control target key end

     0   :  { %8 = vsyncpa [#allocation4], 0  ;;  %s3982_s0 = inlined_call_operand.vmem [shape: f32[4,23808], index: 0, kind: input, shape index: {}]   ;;  %s3983_s1 = inlined_call_operand.hbm [shape: f32[36,23808], index: 1, kind: input, shape index: {}]   ;;  %s3984_s2 = inlined_call_operand.hbm [shape: f32[1,36], index: 2, kind: input, shape index: {}]   ;;  %s3985_s3 = inlined_call_operand.hbm [shape: f32[4,36], index: 3, kind: output, shape index: {}]  }
   0x1   :  { %10 = vsyncpa [#allocation4 + $0x1], 0 }
   0x2   :  { %11 = vsyncpa [#allocation7], 0 }
   0x3   :  { %12 = vsyncpa [#allocation5], 0  ;;  %s3433_s12 = smov 0   ;;  %s3435_s13 = smov 0  }
   0x4   :  { %s3437_s14 = smov 0   ;;  %s3439_s15 = smov 0  }
   0x5 LB: > { %s3452_s16 = sadd.s32 4294967295, %s3404_s15   ;;  %s3455_s17 = sadd.s32 1, %s3404_s15   ;;  %s3404_s15 = sphi %s3439_s15, %s4004_s15   ;;  %s3400_s14 = sphi %s3437_s14, %s4003_s14   ;;  %s3396_s13 = sphi %s3435_s13, %s4002_s13   ;;  %s3392_s12 = sphi %s3433_s12, %s4001_s12  }
   0x6   : > { %s48_s18 = ssub.s32 %s3404_s15, %s3455_s17  ;;  %s51_s19 = sadd.s32 1, %s3400_s14 }
   0x7   : > { %p49_p0 = scmp.eq.s32.totalorder %s48_s18, 0  ;;  %p58_p1 = scmp.ne.s32.totalorder %s3400_s14, %s3396_s13 }
   0x8   : > { %p59_p2 = scmp.eq.s32.totalorder %s3404_s15, 0  ;;  %p64_p3 = scmp.ne.s32.totalorder %s3396_s13, %s3392_s12 }
   0x9   : > { %s3465_s20 = scalar_select %p49_p0, %s3400_s14, %s51_s19  }
   0xa   : > { %p3467_p4 = por %p59_p2, %p58_p1  ;;  %p3986_p5 = scmp.eq.s32.totalorder %s3452_s16, 0 }
   0xb   : > { %p2921_p6 = scmp.ge.s32.totalorder %s3404_s15, 1  ;;  %p117_p7 = scmp.lt.s32.totalorder %s3404_s15, 4 }
   0xc   : > { %p3476_p8 = por %p3986_p5, %p64_p3  ;;  %s3406_s24 = smov [#allocation6]  }
   0xd   : > { %p3481_p10 = pnand %p2921_p6, %p117_p7  ;;  %s130_s25 = sshll.u32 %s3406_s24, 4  ;;  %s131_s25 = int_to_ptr.vmem [resolvable:$true] %s130_s25 }
   0xe   : > { %s3991_s22 = scalar_select %p3476_p8, 1, 0 }
   0xf   : > { %s3992_s23 = scalar_select %p3481_p10, 1, 0 }
  0x10   : > { %p3196_p11 = pneg %p3481_p10  ;;  %p3205_p12 = scmp.lt.s32.totalorder %s3404_s15, 3 }
  0x11   : > { %s150_s26 = sand.u32 1, %s3400_s14   ;;  %s2935_s30 = smul.u32 7936, %s3404_s15 }
  0x12   : > { %p3491_p13 = pnand %p3196_p11, %p3986_p5  ;;  %p3497_p0 = pnand %p3205_p12, %p3467_p4 }
  0x13   : > { %s3184_s29 = smul.u32 2480, %s150_s26  ;;  %s3278_s6 = scalar_lea.hbm %s3984_s2, 16 }
  0x14   : > { %s3994_s28 = scalar_select %p3497_p0, 1, 0 }
  0x15   : > { %p3279_p1 = scmp.ne.s32.totalorder %s3984_s2, %s3278_s6  ;;  %p3280_p2 = pneg %p3491_p13 }
  0x16   : > { %p3285_p4 = scmp.lt.u32.totalorder %s3278_s6, %s3984_s2 }
  0x17   : > { %p3281_p3 = pnand %p3280_p2, %p3279_p1 }
  0x19   : > { %p3282_p6 = pneg %p3281_p3 }
  0x1b   : > { %p3287_p7 = pnand %p3285_p4, %p3282_p6 }
  0x1d   : > { %3290 = shalt.err (!%p3287_p7)
}
  0x1e   : > { %s3291_s11 = scalar_lea.vmem %s131_s25, 16  ;;  %s3298_s12 = scalar_lea.vmem %s131_s25, 32 }
  0x1f   : > { %p3292_p11 = scmp.ne.s32.totalorder %s131_s25, %s3291_s11  ;;  %p3299_p5 = scmp.lt.s32.totalorder %s131_s25, %s131_s25 }
  0x20   : > { %p3300_p8 = scmp.lt.s32.totalorder %s3298_s12, %s3291_s11 }
  0x21   : > { %p3294_p12 = pnand %p3292_p11, %p3280_p2 }
  0x22   : > { %p3301_p10 = por %p3300_p8, %p3299_p5 }
  0x23   : > { %p3295_p9 = pneg %p3294_p12 }
  0x25   : > { %p3302_p0 = pnand %p3301_p10, %p3295_p9 }
  0x27   : > { %3305 = shalt.err (!%p3302_p0)
}
  0x28   : > { %3199 = dma.hbm_to_vmem [thread:$0]  (!%p3491_p13), %s3984_s2, 16, %s131_s25, [#allocation7]  }
  0x29   : > { %s3521_s24 = scalar_lea.hbm %s3983_s1, %s2935_s30  ;;  %s154_s4 = scalar_lea.vmem [#allocation3], %s3184_s29 }
  0x2a   : > { %s161_s5 = sshll.u32 %s154_s4, 4  ;;  %s3525_s27 = scalar_lea.sflag [#allocation4], %s150_s26  ;;  %s3523_s5 = int_to_ptr.vmem [resolvable:$true] %s161_s5 }
  0x2b   : > { %s3306_s6 = scalar_lea.hbm %s3521_s24, 39680  ;;  %p3995_p8 = scmp.ne.s32.totalorder %s3994_s28, 0 }
  0x2c   : > { %p3307_p5 = scmp.ne.s32.totalorder %s3521_s24, %s3306_s6  ;;  %s3311_s7 = scalar_lea.hbm %s3983_s1, 119040 }
  0x2d   : > { %p3308_p9 = pneg %p3995_p8  ;;  %p3312_p0 = scmp.lt.u32.totalorder %s3521_s24, %s3983_s1 }
  0x2e   : > { %p3313_p1 = scmp.lt.u32.totalorder %s3311_s7, %s3306_s6  ;;  %p3315_p3 = scmp.lt.u32.totalorder %s3306_s6, %s3521_s24 }
  0x2f   : > { %p3309_p10 = pnand %p3308_p9, %p3307_p5 }
  0x30   : > { %p3314_p2 = por %p3313_p1, %p3312_p0 }
  0x31   : > { %p3310_p13 = pneg %p3309_p10 }
  0x32   : > { %p3316_p6 = por %p3315_p3, %p3314_p2 }
  0x34   : > { %p3317_p4 = pnand %p3316_p6, %p3310_p13 }
  0x36   : > { %3320 = shalt.err (!%p3317_p4)
}
  0x37   : > { %s3321_s26 = scalar_lea.vmem %s3523_s5, 39680  ;;  %s3407_s29 = smov [#allocation3]  }
  0x38   : > { %p3322_p7 = scmp.ne.s32.totalorder %s3523_s5, %s3321_s26  ;;  %s3326_s10 = sshll.u32 %s3407_s29, 4  ;;  %s3327_s10 = int_to_ptr.vmem [resolvable:$false] %s3326_s10 }
  0x39   : > { %s3328_s11 = scalar_lea.vmem %s3327_s10, 79360  ;;  %p3329_p5 = scmp.lt.s32.totalorder %s3523_s5, %s3327_s10 }
  0x3a   : > { %p3324_p11 = pnand %p3322_p7, %p3308_p9  ;;  %p3330_p10 = scmp.lt.s32.totalorder %s3328_s11, %s3321_s26 }
  0x3c   : > { %p3325_p12 = pneg %p3324_p11  ;;  %p3331_p0 = por %p3330_p10, %p3329_p5 }
  0x3e   : > { %p3332_p1 = pnand %p3331_p0, %p3325_p12 }
  0x40   : > { %3335 = shalt.err (!%p3332_p1)
}
  0x41   : > { %s3408_s12 = smov 23808   ;;  %s3409_s15 = smov 7936  }
  0x42   : > { %s3410_s18 = smov 496   ;;  %p3996_p9 = scmp.ne.s32.totalorder %s3992_s23, 0 }
  0x43   : > { %3203 = dma.hbm_to_vmem [thread:$0]  (!%p3995_p8), %s3521_s24, 39680, %s3523_s5, %s3525_s27, %s3408_s12, %s3409_s15, %s3410_s18  }
  0x44   : > { %173 = sbr.rel (%p3996_p9) target bundleno = 663 (0x297), region = 32  ;;  %s175_s19 = sand.u32 (!%p3996_p9), 1, %s3396_s13  }
  0x45   : > { %s3185_s21 = smul.u32 (!%p3996_p9), 2480, %s175_s19  ;;  %s176_s4 = scalar_lea.sflag (!%p3996_p9), [#allocation4], %s175_s19 }
  0x46   : > { %p3997_p13 = scmp.ne.s32.totalorder (!%p3996_p9), %s3991_s22, 0 }
  0x47   : > { %s3556_s6 = scalar_lea.vmem (!%p3996_p9), [#allocation3], %s3185_s21 }
  0x4b   : > { %3379 = dma.done.wait (%p3997_p13), %s176_s4, 39680  }
  0x4c   : > { %3381 = vsyncadd (%p3997_p13), %s176_s4, 4294927616  ;;  %p3998_p2 = scmp.eq.s32.totalorder %s3452_s16, 0 }
  0x4e   : > { %3383 = dma.done.wait (%p3998_p2), [#allocation7], 16   ;;  %p3999_p8 = pmov %p3998_p2 }
  0x4f   : > { %s206_s23 = smul.u32 62, %s3452_s16  ;;  %p4000_p6 = scmp.ne.s32.totalorder %s3452_s16, 0 }
  0x50   : > { %3385 = vsyncadd (%p3999_p8), [#allocation7], 4294967280  ;;  %vm217_vm0 = vcmask (!%p4000_p6), 289792   ;;  %v3411_v0 = vmov (!%p4000_p6), 0.0  }
  0x51   : > { %p207_p3 = scmp.lt.s32.totalorder %s206_s23, 185  ;;  %216 = sbr.rel (%p4000_p6) target bundleno = 88 (0x58), region = 44  ;;  %218 = vst.msk [vmem:[#allocation2] sm:$0xf] (!%p4000_p6), %vm217_vm0, %v3411_v0 }
  0x53   : > { %s4006_s23 = smov (!%p207_p3, %s206_s23), 185 }
  0x54   : > { %s2927_s28 = sshll.u32 %s4006_s23, 2 }
  0x55   : > { %s3570_s27 = scalar_lea.vmem %s3982_s0, %s2927_s28 }
  0x58 PF: > { %v252_v1 = vld [vmem:[%s3556_s6 + $0x8] sm:$0xff]  ;;  %v314_v2 = vld [vmem:[%s3556_s6 + $0x1f8] sm:$0xff]  ;;  %v251_v3 = vld [vmem:[%s3556_s6] sm:$0xff]  ;;  %vm2825_vm1 = vcmask 289792   ;;  %p2929_p4 = scmp.ne.s32.totalorder %s3452_s16, 2 }
  0x59   : > { %v2936_v4 = vpack.c.bf16 %v314_v2, %v252_v1  ;;  %v313_v5 = vld [vmem:[%s3556_s6 + $0x1f0] sm:$0xff]  ;;  %v254_v6 = vld [vmem:[%s3556_s6 + $0x18] sm:$0xff]  ;;  %v316_v7 = vld [vmem:[%s3556_s6 + $0x208] sm:$0xff] }
  0x5a   : > { %v2938_v8 = vpack.c.bf16 %v313_v5, %v251_v3  ;;  %v2944_v9 = vpack.c.bf16 %v316_v7, %v254_v6  ;;  %v253_v10 = vld [vmem:[%s3556_s6 + $0x10] sm:$0xff]  ;;  %v315_v11 = vld [vmem:[%s3556_s6 + $0x200] sm:$0xff]  ;;  %v376_v12 = vld [vmem:[%s3556_s6 + $0x3e8] sm:$0xff] }
  0x5b   : > { %2937 = vmatprep.subr.bf16.mxu0 %v2936_v4  ;;  %v2946_v13 = vpack.c.bf16 %v315_v11, %v253_v10  ;;  %v438_v14 = vld [vmem:[%s3556_s6 + $0x5d8] sm:$0xff]  ;;  %v440_v17 = vld [vmem:[%s3556_s6 + $0x5e8] sm:$0xff]  ;;  %v375_v18 = vld [vmem:[%s3556_s6 + $0x3e0] sm:$0xff] }
  0x5c   : > { %2939 = vmatpush1.bf16.xpose.msra.mxu0 %v2938_v8  ;;  %2945 = vmatprep.subr.bf16.mxu1 %v2944_v9  ;;  %v2940_v15 = vpack.c.bf16 %v438_v14, %v376_v12  ;;  %v378_v16 = vld [vmem:[%s3556_s6 + $0x3f8] sm:$0xff]  ;;  %v437_v19 = vld [vmem:[%s3556_s6 + $0x5d0] sm:$0xff]  ;;  %v439_v22 = vld [vmem:[%s3556_s6 + $0x5e0] sm:$0xff] }
  0x5d   : > { %2947 = vmatpush1.bf16.xpose.msra.mxu1 %v2946_v13  ;;  %v2948_v20 = vpack.c.bf16 %v440_v17, %v378_v16  ;;  %v377_v21 = vld [vmem:[%s3556_s6 + $0x3f0] sm:$0xff]  ;;  %v2942_v26 = vpack.c.bf16 %v437_v19, %v375_v18  ;;  %v500_v29 = vld [vmem:[%s3556_s6 + $0x7c8] sm:$0xf]  ;;  %v502_v30 = vld [vmem:[%s3556_s6 + $0x7d8] sm:$0xf] }
  0x5e   : > { %2941 = vmatprep.subr.bf16.mxu0 %v2940_v15  ;;  %v220_v23 = vld [vmem:[%s3570_s27] sm:$0xff]  ;;  %v221_v25 = vld [vmem:[%s3570_s27 + $0x8] sm:$0xff]  ;;  %v2950_v28 = vpack.c.bf16 %v439_v22, %v377_v21  ;;  %v222_v47 = vld [vmem:[%s3570_s27 + $0x10] sm:$0xff] }
  0x5f   : > { %2949 = vmatprep.subr.bf16.mxu1 %v2948_v20  ;;  %v592_v24 = vcombine.high %v220_v23, %v220_v23  ;;  %v593_v27 = vcombine.high %v221_v25, %v221_v25  ;;  %v256_v31 = vld [vmem:[%s3556_s6 + $0x28] sm:$0xff]  ;;  %v318_v32 = vld [vmem:[%s3556_s6 + $0x218] sm:$0xff]  ;;  %v499_v35 = vld [vmem:[%s3556_s6 + $0x7c0] sm:$0xf]  ;;  %v594_v53 = vcombine.high %v222_v47, %v222_v47 }
  0x60   : > { %v258_v33 = vld [vmem:[%s3556_s6 + $0x38] sm:$0xff]  ;;  %v320_v34 = vld [vmem:[%s3556_s6 + $0x228] sm:$0xff]  ;;  %v501_v36 = vld [vmem:[%s3556_s6 + $0x7d0] sm:$0xf]  ;;  %v2952_v37 = vpack.c.bf16 %v318_v32, %v256_v31 }
  0x61   : > { %718 = vmatprep.mubr.f32.mxu0 %v592_v24  ;;  %788 = vmatprep.mubr.f32.mxu1 %v593_v27  ;;  %v255_v38 = vld [vmem:[%s3556_s6 + $0x20] sm:$0xff]  ;;  %v317_v39 = vld [vmem:[%s3556_s6 + $0x210] sm:$0xff]  ;;  %v2960_v41 = vpack.c.bf16 %v320_v34, %v258_v33  ;;  %v380_v43 = vld [vmem:[%s3556_s6 + $0x408] sm:$0xff] }
  0x62   : > { %v257_v40 = vld [vmem:[%s3556_s6 + $0x30] sm:$0xff]  ;;  %v319_v42 = vld [vmem:[%s3556_s6 + $0x220] sm:$0xff]  ;;  %v442_v44 = vld [vmem:[%s3556_s6 + $0x5f8] sm:$0xff]  ;;  %v2954_v48 = vpack.c.bf16 %v317_v39, %v255_v38 }
  0x63   : > { %v382_v45 = vld [vmem:[%s3556_s6 + $0x418] sm:$0xff]  ;;  %v444_v46 = vld [vmem:[%s3556_s6 + $0x608] sm:$0xff]  ;;  %v2962_v50 = vpack.c.bf16 %v319_v42, %v257_v40  ;;  %v2956_v51 = vpack.c.bf16 %v442_v44, %v380_v43  ;;  %v379_v55 = vld [vmem:[%s3556_s6 + $0x400] sm:$0xff] }
  0x64   : > { %2943 = vmatpush1.bf16.xpose.msra.mxu0 %v2942_v26  ;;  %v223_v49 = vld [vmem:[%s3570_s27 + $0x18] sm:$0xff]  ;;  %v2964_v52 = vpack.c.bf16 %v444_v46, %v382_v45  ;;  %v503_v3 = vld [vmem:[%s3556_s6 + $0x7e0] sm:$0xf]  ;;  %v505_v4 = vld [vmem:[%s3556_s6 + $0x7f0] sm:$0xf] }
  0x65   : > { %2951 = vmatpush1.bf16.xpose.msra.mxu1 %v2950_v28  ;;  %662 = vmatprep.subr.mxu0 %v500_v29  ;;  %v595_v54 = vcombine.high %v223_v49, %v223_v49  ;;  %v441_v56 = vld [vmem:[%s3556_s6 + $0x5f0] sm:$0xff]  ;;  %v443_v58 = vld [vmem:[%s3556_s6 + $0x600] sm:$0xff]  ;;  %v504_v61 = vld [vmem:[%s3556_s6 + $0x7e8] sm:$0xf] }
  0x66   : > { %732 = vmatprep.subr.mxu1 %v502_v30  ;;  %v381_v57 = vld [vmem:[%s3556_s6 + $0x410] sm:$0xff]  ;;  %v2958_v59 = vpack.c.bf16 %v441_v56, %v379_v55  ;;  %v506_v62 = vld [vmem:[%s3556_s6 + $0x7f8] sm:$0xf]  ;;  %v260_v63 = vld [vmem:[%s3556_s6 + $0x48] sm:$0xff] }
  0x67   : > { %v2966_v60 = vpack.c.bf16 %v443_v58, %v381_v57  ;;  %v322_v0 = vld [vmem:[%s3556_s6 + $0x238] sm:$0xff]  ;;  %v324_v2 = vld [vmem:[%s3556_s6 + $0x248] sm:$0xff]  ;;  %v259_v6 = vld [vmem:[%s3556_s6 + $0x40] sm:$0xff] }
  0x68   : > { %v262_v1 = vld [vmem:[%s3556_s6 + $0x58] sm:$0xff]  ;;  %v2968_v5 = vpack.c.bf16 %v322_v0, %v260_v63  ;;  %v321_v7 = vld [vmem:[%s3556_s6 + $0x230] sm:$0xff]  ;;  %v323_v10 = vld [vmem:[%s3556_s6 + $0x240] sm:$0xff] }
  0x69   : > { %v261_v8 = vld [vmem:[%s3556_s6 + $0x50] sm:$0xff]  ;;  %v2976_v9 = vpack.c.bf16 %v324_v2, %v262_v1  ;;  %v384_v11 = vld [vmem:[%s3556_s6 + $0x428] sm:$0xff]  ;;  %v446_v12 = vld [vmem:[%s3556_s6 + $0x618] sm:$0xff]  ;;  %v2970_v16 = vpack.c.bf16 %v321_v7, %v259_v6 }
  0x6a   : > { %v386_v13 = vld [vmem:[%s3556_s6 + $0x438] sm:$0xff]  ;;  %v448_v14 = vld [vmem:[%s3556_s6 + $0x628] sm:$0xff]  ;;  %v2978_v18 = vpack.c.bf16 %v323_v10, %v261_v8  ;;  %v2972_v19 = vpack.c.bf16 %v446_v12, %v384_v11  ;;  %v445_v24 = vld [vmem:[%s3556_s6 + $0x610] sm:$0xff] }
  0x6b   : > { %v224_v15 = vld [vmem:[%s3570_s27 + $0x20] sm:$0xff]  ;;  %v225_v17 = vld [vmem:[%s3570_s27 + $0x28] sm:$0xff]  ;;  %v2980_v20 = vpack.c.bf16 %v448_v14, %v386_v13 }
  0x6c   : > { %663 = vmatpush1.xpose.msra.mxu0 %v499_v35  ;;  %v596_v21 = vcombine.high %v224_v15, %v224_v15  ;;  %v597_v22 = vcombine.high %v225_v17, %v225_v17  ;;  %v447_v26 = vld [vmem:[%s3556_s6 + $0x620] sm:$0xff]  ;;  %v508_v29 = vld [vmem:[%s3556_s6 + $0x808] sm:$0xf]  ;;  %v510_v30 = vld [vmem:[%s3556_s6 + $0x818] sm:$0xf] }
  0x6d   : > { %733 = vmatpush1.xpose.msra.mxu1 %v501_v36  ;;  %2953 = vmatprep.subr.bf16.mxu0 %v2952_v37  ;;  %v264_v31 = vld [vmem:[%s3556_s6 + $0x68] sm:$0xff]  ;;  %v326_v32 = vld [vmem:[%s3556_s6 + $0x258] sm:$0xff]  ;;  %v507_v35 = vld [vmem:[%s3556_s6 + $0x800] sm:$0xf] }
  0x6e   : > { %2961 = vmatprep.subr.bf16.mxu1 %v2960_v41  ;;  %v266_v33 = vld [vmem:[%s3556_s6 + $0x78] sm:$0xff]  ;;  %v328_v34 = vld [vmem:[%s3556_s6 + $0x268] sm:$0xff]  ;;  %v509_v36 = vld [vmem:[%s3556_s6 + $0x810] sm:$0xf]  ;;  %v2984_v37 = vpack.c.bf16 %v326_v32, %v264_v31 }
  0x6f   : > { %719 = vmatmul.mubr.f32.vlgmr.msra.gmra.mrb[0].mxu0 %v220_v23  ;;  %v383_v23 = vld [vmem:[%s3556_s6 + $0x420] sm:$0xff]  ;;  %v325_v39 = vld [vmem:[%s3556_s6 + $0x250] sm:$0xff]  ;;  %v2992_v41 = vpack.c.bf16 %v328_v34, %v266_v33  ;;  %v388_v43 = vld [vmem:[%s3556_s6 + $0x448] sm:$0xff] }
  0x70   : > { %789 = vmatmul.mubr.f32.vlgmr.msra.gmra.mrb[0].mxu1 %v221_v25  ;;  %2955 = vmatpush1.bf16.xpose.msra.mxu0 %v2954_v48  ;;  %v385_v25 = vld [vmem:[%s3556_s6 + $0x430] sm:$0xff]  ;;  %v2974_v27 = vpack.c.bf16 %v445_v24, %v383_v23  ;;  %v263_v38 = vld [vmem:[%s3556_s6 + $0x60] sm:$0xff]  ;;  %v450_v44 = vld [vmem:[%s3556_s6 + $0x638] sm:$0xff] }
  0x71   : > { %2963 = vmatpush1.bf16.xpose.msra.mxu1 %v2962_v50  ;;  %2957 = vmatprep.subr.bf16.mxu0 %v2956_v51  ;;  %v2982_v28 = vpack.c.bf16 %v447_v26, %v385_v25  ;;  %v265_v40 = vld [vmem:[%s3556_s6 + $0x70] sm:$0xff]  ;;  %v327_v42 = vld [vmem:[%s3556_s6 + $0x260] sm:$0xff]  ;;  %v390_v45 = vld [vmem:[%s3556_s6 + $0x458] sm:$0xff]  ;;  %v2986_v48 = vpack.c.bf16 %v325_v39, %v263_v38  ;;  %v2988_v51 = vpack.c.bf16 %v450_v44, %v388_v43 }
  0x72   : > { %2965 = vmatprep.subr.bf16.mxu1 %v2964_v52  ;;  %858 = vmatprep.mubr.f32.mxu0 %v594_v53  ;;  %v452_v46 = vld [vmem:[%s3556_s6 + $0x648] sm:$0xff]  ;;  %v2994_v50 = vpack.c.bf16 %v327_v42, %v265_v40  ;;  %v387_v55 = vld [vmem:[%s3556_s6 + $0x440] sm:$0xff]  ;;  %v449_v56 = vld [vmem:[%s3556_s6 + $0x630] sm:$0xff] }
  0x73   : > { %928 = vmatprep.mubr.f32.mxu1 %v595_v54  ;;  %v2996_v52 = vpack.c.bf16 %v452_v46, %v390_v45  ;;  %v389_v57 = vld [vmem:[%s3556_s6 + $0x450] sm:$0xff]  ;;  %v451_v58 = vld [vmem:[%s3556_s6 + $0x640] sm:$0xff]  ;;  %v268_v63 = vld [vmem:[%s3556_s6 + $0x88] sm:$0xff] }
  0x74   : > { %v330_v0 = vld [vmem:[%s3556_s6 + $0x278] sm:$0xff]  ;;  %v332_v2 = vld [vmem:[%s3556_s6 + $0x288] sm:$0xff]  ;;  %v267_v6 = vld [vmem:[%s3556_s6 + $0x80] sm:$0xff] }
  0x75   : > { %v270_v1 = vld [vmem:[%s3556_s6 + $0x98] sm:$0xff]  ;;  %v329_v7 = vld [vmem:[%s3556_s6 + $0x270] sm:$0xff]  ;;  %v331_v10 = vld [vmem:[%s3556_s6 + $0x280] sm:$0xff] }
  0x76   : > { %v269_v8 = vld [vmem:[%s3556_s6 + $0x90] sm:$0xff]  ;;  %v392_v11 = vld [vmem:[%s3556_s6 + $0x468] sm:$0xff]  ;;  %v454_v12 = vld [vmem:[%s3556_s6 + $0x658] sm:$0xff] }
  0x77   : > { %v394_v13 = vld [vmem:[%s3556_s6 + $0x478] sm:$0xff]  ;;  %v456_v14 = vld [vmem:[%s3556_s6 + $0x668] sm:$0xff]  ;;  %v391_v23 = vld [vmem:[%s3556_s6 + $0x460] sm:$0xff] }
  0x78   : > { %2959 = vmatpush1.bf16.xpose.msra.mxu0 %v2958_v59  ;;  %v2990_v59 = vpack.c.bf16 %v449_v56, %v387_v55  ;;  %v453_v24 = vld [vmem:[%s3556_s6 + $0x650] sm:$0xff]  ;;  %v455_v26 = vld [vmem:[%s3556_s6 + $0x660] sm:$0xff]  ;;  %v272_v31 = vld [vmem:[%s3556_s6 + $0xa8] sm:$0xff] }
  0x79   : > { %2967 = vmatpush1.bf16.xpose.msra.mxu1 %v2966_v60  ;;  %802 = vmatprep.subr.mxu0 %v504_v61  ;;  %v2998_v60 = vpack.c.bf16 %v451_v58, %v389_v57  ;;  %v512_v61 = vld [vmem:[%s3556_s6 + $0x828] sm:$0xf]  ;;  %v393_v25 = vld [vmem:[%s3556_s6 + $0x470] sm:$0xff]  ;;  %v334_v32 = vld [vmem:[%s3556_s6 + $0x298] sm:$0xff] }
  0x7a   : > { %872 = vmatprep.subr.mxu1 %v506_v62  ;;  %v514_v62 = vld [vmem:[%s3556_s6 + $0x838] sm:$0xf]  ;;  %v336_v34 = vld [vmem:[%s3556_s6 + $0x2a8] sm:$0xff]  ;;  %v271_v38 = vld [vmem:[%s3556_s6 + $0xa0] sm:$0xff] }
  0x7b   : > { %v274_v33 = vld [vmem:[%s3556_s6 + $0xb8] sm:$0xff]  ;;  %v333_v39 = vld [vmem:[%s3556_s6 + $0x290] sm:$0xff]  ;;  %v335_v42 = vld [vmem:[%s3556_s6 + $0x2a0] sm:$0xff] }
  0x7c   : > { %v273_v40 = vld [vmem:[%s3556_s6 + $0xb0] sm:$0xff]  ;;  %v396_v43 = vld [vmem:[%s3556_s6 + $0x488] sm:$0xff]  ;;  %v458_v44 = vld [vmem:[%s3556_s6 + $0x678] sm:$0xff] }
  0x7d   : > { %v398_v45 = vld [vmem:[%s3556_s6 + $0x498] sm:$0xff]  ;;  %v460_v46 = vld [vmem:[%s3556_s6 + $0x688] sm:$0xff]  ;;  %v395_v55 = vld [vmem:[%s3556_s6 + $0x480] sm:$0xff] }
  0x7e   : > { %v457_v56 = vld [vmem:[%s3556_s6 + $0x670] sm:$0xff]  ;;  %v459_v58 = vld [vmem:[%s3556_s6 + $0x680] sm:$0xff] }
  0x7f   : > { %v397_v57 = vld [vmem:[%s3556_s6 + $0x490] sm:$0xff] }
  0x80   : > { %803 = vmatpush1.xpose.msra.mxu0 %v503_v3  ;;  %v511_v3 = vld [vmem:[%s3556_s6 + $0x820] sm:$0xf] }
  0x81   : > { %873 = vmatpush1.xpose.msra.mxu1 %v505_v4  ;;  %2969 = vmatprep.subr.bf16.mxu0 %v2968_v5  ;;  %v513_v4 = vld [vmem:[%s3556_s6 + $0x830] sm:$0xf]  ;;  %v3000_v5 = vpack.c.bf16 %v330_v0, %v268_v63  ;;  %v276_v63 = vld [vmem:[%s3556_s6 + $0xc8] sm:$0xff]  ;;  %v338_v0 = vld [vmem:[%s3556_s6 + $0x2b8] sm:$0xff] }
  0x82   : > { %2977 = vmatprep.subr.bf16.mxu1 %v2976_v9  ;;  %v3008_v9 = vpack.c.bf16 %v332_v2, %v270_v1  ;;  %v278_v1 = vld [vmem:[%s3556_s6 + $0xd8] sm:$0xff]  ;;  %v340_v2 = vld [vmem:[%s3556_s6 + $0x2c8] sm:$0xff] }
  0x83   : > { %859 = vmatmul.mubr.f32.vlgmr.msra.gmra.mrb[2].mxu0 %v222_v47  ;;  %v226_v47 = vld [vmem:[%s3570_s27 + $0x30] sm:$0xff] }
  0x84   : > { %2971 = vmatpush1.bf16.xpose.msra.mxu0 %v2970_v16  ;;  %929 = vmatmul.mubr.f32.vlgmr.msra.gmra.mrb[2].mxu1 %v223_v49  ;;  %v227_v49 = vld [vmem:[%s3570_s27 + $0x38] sm:$0xff]  ;;  %v598_v53 = vcombine.high %v226_v47, %v226_v47  ;;  %v3002_v16 = vpack.c.bf16 %v329_v7, %v267_v6 }
  0x85   : > { %2979 = vmatpush1.bf16.xpose.msra.mxu1 %v2978_v18  ;;  %2973 = vmatprep.subr.bf16.mxu0 %v2972_v19  ;;  %v599_v54 = vcombine.high %v227_v49, %v227_v49  ;;  %v3010_v18 = vpack.c.bf16 %v331_v10, %v269_v8  ;;  %v3004_v19 = vpack.c.bf16 %v454_v12, %v392_v11  ;;  %v275_v6 = vld [vmem:[%s3556_s6 + $0xc0] sm:$0xff]  ;;  %v337_v7 = vld [vmem:[%s3556_s6 + $0x2b0] sm:$0xff]  ;;  %v400_v11 = vld [vmem:[%s3556_s6 + $0x4a8] sm:$0xff] }
  0x86   : > { %2981 = vmatprep.subr.bf16.mxu1 %v2980_v20  ;;  %998 = vmatprep.mubr.f32.mxu0 %v596_v21  ;;  %v3012_v20 = vpack.c.bf16 %v456_v14, %v394_v13  ;;  %v277_v8 = vld [vmem:[%s3556_s6 + $0xd0] sm:$0xff]  ;;  %v339_v10 = vld [vmem:[%s3556_s6 + $0x2c0] sm:$0xff]  ;;  %v462_v12 = vld [vmem:[%s3556_s6 + $0x698] sm:$0xff] }
  0x87   : > { %1068 = vmatprep.mubr.f32.mxu1 %v597_v22  ;;  %v402_v13 = vld [vmem:[%s3556_s6 + $0x4b8] sm:$0xff]  ;;  %v464_v14 = vld [vmem:[%s3556_s6 + $0x6a8] sm:$0xff] }
  0x8c   : > { %2975 = vmatpush1.bf16.xpose.msra.mxu0 %v2974_v27  ;;  %v3006_v27 = vpack.c.bf16 %v453_v24, %v391_v23  ;;  %v399_v23 = vld [vmem:[%s3556_s6 + $0x4a0] sm:$0xff]  ;;  %v461_v24 = vld [vmem:[%s3556_s6 + $0x690] sm:$0xff] }
  0x8d   : > { %2983 = vmatpush1.bf16.xpose.msra.mxu1 %v2982_v28  ;;  %942 = vmatprep.subr.mxu0 %v508_v29  ;;  %v3014_v28 = vpack.c.bf16 %v455_v26, %v393_v25  ;;  %v516_v29 = vld [vmem:[%s3556_s6 + $0x848] sm:$0xf]  ;;  %v401_v25 = vld [vmem:[%s3556_s6 + $0x4b0] sm:$0xff]  ;;  %v463_v26 = vld [vmem:[%s3556_s6 + $0x6a0] sm:$0xff] }
  0x8e   : > { %1012 = vmatprep.subr.mxu1 %v510_v30  ;;  %v518_v30 = vld [vmem:[%s3556_s6 + $0x858] sm:$0xf] }
  0x94   : > { %943 = vmatpush1.xpose.msra.mxu0 %v507_v35  ;;  %v515_v35 = vld [vmem:[%s3556_s6 + $0x840] sm:$0xf] }
  0x95   : > { %1013 = vmatpush1.xpose.msra.mxu1 %v509_v36  ;;  %2985 = vmatprep.subr.bf16.mxu0 %v2984_v37  ;;  %v517_v36 = vld [vmem:[%s3556_s6 + $0x850] sm:$0xf]  ;;  %v3016_v37 = vpack.c.bf16 %v334_v32, %v272_v31  ;;  %v280_v31 = vld [vmem:[%s3556_s6 + $0xe8] sm:$0xff]  ;;  %v342_v32 = vld [vmem:[%s3556_s6 + $0x2d8] sm:$0xff] }
  0x96   : > { %2993 = vmatprep.subr.bf16.mxu1 %v2992_v41  ;;  %v3024_v41 = vpack.c.bf16 %v336_v34, %v274_v33  ;;  %v282_v33 = vld [vmem:[%s3556_s6 + $0xf8] sm:$0xff]  ;;  %v344_v34 = vld [vmem:[%s3556_s6 + $0x2e8] sm:$0xff] }
  0x97   : > { %999 = vmatmul.mubr.f32.vlgmr.msra.gmra.mrb[4].mxu0 %v224_v15  ;;  %v228_v15 = vld [vmem:[%s3570_s27 + $0x40] sm:$0xff] }
  0x98   : > { %2987 = vmatpush1.bf16.xpose.msra.mxu0 %v2986_v48  ;;  %1069 = vmatmul.mubr.f32.vlgmr.msra.gmra.mrb[4].mxu1 %v225_v17  ;;  %v229_v17 = vld [vmem:[%s3570_s27 + $0x48] sm:$0xff]  ;;  %v600_v21 = vcombine.high %v228_v15, %v228_v15  ;;  %v3018_v48 = vpack.c.bf16 %v333_v39, %v271_v38 }
  0x99   : > { %2995 = vmatpush1.bf16.xpose.msra.mxu1 %v2994_v50  ;;  %2989 = vmatprep.subr.bf16.mxu0 %v2988_v51  ;;  %v601_v22 = vcombine.high %v229_v17, %v229_v17  ;;  %v3026_v50 = vpack.c.bf16 %v335_v42, %v273_v40  ;;  %v3020_v51 = vpack.c.bf16 %v458_v44, %v396_v43  ;;  %v279_v38 = vld [vmem:[%s3556_s6 + $0xe0] sm:$0xff]  ;;  %v341_v39 = vld [vmem:[%s3556_s6 + $0x2d0] sm:$0xff]  ;;  %v404_v43 = vld [vmem:[%s3556_s6 + $0x4c8] sm:$0xff] }
  0x9a   : > { %2997 = vmatprep.subr.bf16.mxu1 %v2996_v52  ;;  %1138 = vmatprep.mubr.f32.mxu0 %v598_v53  ;;  %v3028_v52 = vpack.c.bf16 %v460_v46, %v398_v45  ;;  %v281_v40 = vld [vmem:[%s3556_s6 + $0xf0] sm:$0xff]  ;;  %v343_v42 = vld [vmem:[%s3556_s6 + $0x2e0] sm:$0xff]  ;;  %v466_v44 = vld [vmem:[%s3556_s6 + $0x6b8] sm:$0xff] }
  0x9b   : > { %1208 = vmatprep.mubr.f32.mxu1 %v599_v54  ;;  %v406_v45 = vld [vmem:[%s3556_s6 + $0x4d8] sm:$0xff]  ;;  %v468_v46 = vld [vmem:[%s3556_s6 + $0x6c8] sm:$0xff] }
  0xa0   : > { %2991 = vmatpush1.bf16.xpose.msra.mxu0 %v2990_v59  ;;  %v3022_v59 = vpack.c.bf16 %v457_v56, %v395_v55  ;;  %v403_v55 = vld [vmem:[%s3556_s6 + $0x4c0] sm:$0xff]  ;;  %v465_v56 = vld [vmem:[%s3556_s6 + $0x6b0] sm:$0xff] }
  0xa1   : > { %2999 = vmatpush1.bf16.xpose.msra.mxu1 %v2998_v60  ;;  %1082 = vmatprep.subr.mxu0 %v512_v61  ;;  %v3030_v60 = vpack.c.bf16 %v459_v58, %v397_v57  ;;  %v520_v61 = vld [vmem:[%s3556_s6 + $0x868] sm:$0xf]  ;;  %v405_v57 = vld [vmem:[%s3556_s6 + $0x4d0] sm:$0xff]  ;;  %v467_v58 = vld [vmem:[%s3556_s6 + $0x6c0] sm:$0xff] }
  0xa2   : > { %1152 = vmatprep.subr.mxu1 %v514_v62  ;;  %v522_v62 = vld [vmem:[%s3556_s6 + $0x878] sm:$0xf] }
  0xa8   : > { %1083 = vmatpush1.xpose.msra.mxu0 %v511_v3  ;;  %v519_v3 = vld [vmem:[%s3556_s6 + $0x860] sm:$0xf] }
  0xa9   : > { %1153 = vmatpush1.xpose.msra.mxu1 %v513_v4  ;;  %3001 = vmatprep.subr.bf16.mxu0 %v3000_v5  ;;  %v521_v4 = vld [vmem:[%s3556_s6 + $0x870] sm:$0xf]  ;;  %v3032_v5 = vpack.c.bf16 %v338_v0, %v276_v63  ;;  %v284_v63 = vld [vmem:[%s3556_s6 + $0x108] sm:$0xff]  ;;  %v346_v0 = vld [vmem:[%s3556_s6 + $0x2f8] sm:$0xff] }
  0xaa   : > { %3009 = vmatprep.subr.bf16.mxu1 %v3008_v9  ;;  %v3040_v9 = vpack.c.bf16 %v340_v2, %v278_v1  ;;  %v286_v1 = vld [vmem:[%s3556_s6 + $0x118] sm:$0xff]  ;;  %v348_v2 = vld [vmem:[%s3556_s6 + $0x308] sm:$0xff] }
  0xab   : > { %1139 = vmatmul.mubr.f32.vlgmr.msra.gmra.mrb[6].mxu0 %v226_v47  ;;  %v230_v47 = vld [vmem:[%s3570_s27 + $0x50] sm:$0xff] }
  0xac   : > { %3003 = vmatpush1.bf16.xpose.msra.mxu0 %v3002_v16  ;;  %1209 = vmatmul.mubr.f32.vlgmr.msra.gmra.mrb[6].mxu1 %v227_v49  ;;  %v231_v49 = vld [vmem:[%s3570_s27 + $0x58] sm:$0xff]  ;;  %v602_v53 = vcombine.high %v230_v47, %v230_v47  ;;  %v3034_v16 = vpack.c.bf16 %v337_v7, %v275_v6 }
  0xad   : > { %3011 = vmatpush1.bf16.xpose.msra.mxu1 %v3010_v18  ;;  %3005 = vmatprep.subr.bf16.mxu0 %v3004_v19  ;;  %v603_v54 = vcombine.high %v231_v49, %v231_v49  ;;  %v3042_v18 = vpack.c.bf16 %v339_v10, %v277_v8  ;;  %v3036_v19 = vpack.c.bf16 %v462_v12, %v400_v11  ;;  %v283_v6 = vld [vmem:[%s3556_s6 + $0x100] sm:$0xff]  ;;  %v345_v7 = vld [vmem:[%s3556_s6 + $0x2f0] sm:$0xff]  ;;  %v408_v11 = vld [vmem:[%s3556_s6 + $0x4e8] sm:$0xff] }
  0xae   : > { %3013 = vmatprep.subr.bf16.mxu1 %v3012_v20  ;;  %1278 = vmatprep.mubr.f32.mxu0 %v600_v21  ;;  %v3044_v20 = vpack.c.bf16 %v464_v14, %v402_v13  ;;  %v285_v8 = vld [vmem:[%s3556_s6 + $0x110] sm:$0xff]  ;;  %v347_v10 = vld [vmem:[%s3556_s6 + $0x300] sm:$0xff]  ;;  %v470_v12 = vld [vmem:[%s3556_s6 + $0x6d8] sm:$0xff] }
  0xaf   : > { %1348 = vmatprep.mubr.f32.mxu1 %v601_v22  ;;  %v410_v13 = vld [vmem:[%s3556_s6 + $0x4f8] sm:$0xff]  ;;  %v472_v14 = vld [vmem:[%s3556_s6 + $0x6e8] sm:$0xff] }
  0xb4   : > { %3007 = vmatpush1.bf16.xpose.msra.mxu0 %v3006_v27  ;;  %v3038_v27 = vpack.c.bf16 %v461_v24, %v399_v23  ;;  %v407_v23 = vld [vmem:[%s3556_s6 + $0x4e0] sm:$0xff]  ;;  %v469_v24 = vld [vmem:[%s3556_s6 + $0x6d0] sm:$0xff] }
  0xb5   : > { %3015 = vmatpush1.bf16.xpose.msra.mxu1 %v3014_v28  ;;  %1222 = vmatprep.subr.mxu0 %v516_v29  ;;  %v3046_v28 = vpack.c.bf16 %v463_v26, %v401_v25  ;;  %v524_v29 = vld [vmem:[%s3556_s6 + $0x888] sm:$0xf]  ;;  %v409_v25 = vld [vmem:[%s3556_s6 + $0x4f0] sm:$0xff]  ;;  %v471_v26 = vld [vmem:[%s3556_s6 + $0x6e0] sm:$0xff] }
  0xb6   : > { %1292 = vmatprep.subr.mxu1 %v518_v30  ;;  %v526_v30 = vld [vmem:[%s3556_s6 + $0x898] sm:$0xf] }
  0xbc   : > { %1223 = vmatpush1.xpose.msra.mxu0 %v515_v35  ;;  %v523_v35 = vld [vmem:[%s3556_s6 + $0x880] sm:$0xf] }
  0xbd   : > { %1293 = vmatpush1.xpose.msra.mxu1 %v517_v36  ;;  %3017 = vmatprep.subr.bf16.mxu0 %v3016_v37  ;;  %v525_v36 = vld [vmem:[%s3556_s6 + $0x890] sm:$0xf]  ;;  %v3048_v37 = vpack.c.bf16 %v342_v32, %v280_v31  ;;  %v288_v31 = vld [vmem:[%s3556_s6 + $0x128] sm:$0xff]  ;;  %v350_v32 = vld [vmem:[%s3556_s6 + $0x318] sm:$0xff] }
  0xbe   : > { %3025 = vmatprep.subr.bf16.mxu1 %v3024_v41  ;;  %v3056_v41 = vpack.c.bf16 %v344_v34, %v282_v33  ;;  %v290_v33 = vld [vmem:[%s3556_s6 + $0x138] sm:$0xff]  ;;  %v352_v34 = vld [vmem:[%s3556_s6 + $0x328] sm:$0xff] }
  0xbf   : > { %1279 = vmatmul.mubr.f32.vlgmr.msra.gmra.mrb[8].mxu0 %v228_v15  ;;  %v232_v15 = vld [vmem:[%s3570_s27 + $0x60] sm:$0xff] }
  0xc0   : > { %3019 = vmatpush1.bf16.xpose.msra.mxu0 %v3018_v48  ;;  %1349 = vmatmul.mubr.f32.vlgmr.msra.gmra.mrb[8].mxu1 %v229_v17  ;;  %v233_v17 = vld [vmem:[%s3570_s27 + $0x68] sm:$0xff]  ;;  %v604_v21 = vcombine.high %v232_v15, %v232_v15  ;;  %v3050_v48 = vpack.c.bf16 %v341_v39, %v279_v38 }
  0xc1   : > { %3027 = vmatpush1.bf16.xpose.msra.mxu1 %v3026_v50  ;;  %3021 = vmatprep.subr.bf16.mxu0 %v3020_v51  ;;  %v605_v22 = vcombine.high %v233_v17, %v233_v17  ;;  %v3058_v50 = vpack.c.bf16 %v343_v42, %v281_v40  ;;  %v3052_v51 = vpack.c.bf16 %v466_v44, %v404_v43  ;;  %v287_v38 = vld [vmem:[%s3556_s6 + $0x120] sm:$0xff]  ;;  %v349_v39 = vld [vmem:[%s3556_s6 + $0x310] sm:$0xff]  ;;  %v412_v43 = vld [vmem:[%s3556_s6 + $0x508] sm:$0xff] }
  0xc2   : > { %3029 = vmatprep.subr.bf16.mxu1 %v3028_v52  ;;  %1418 = vmatprep.mubr.f32.mxu0 %v602_v53  ;;  %v3060_v52 = vpack.c.bf16 %v468_v46, %v406_v45  ;;  %v289_v40 = vld [vmem:[%s3556_s6 + $0x130] sm:$0xff]  ;;  %v351_v42 = vld [vmem:[%s3556_s6 + $0x320] sm:$0xff]  ;;  %v474_v44 = vld [vmem:[%s3556_s6 + $0x6f8] sm:$0xff] }
  0xc3   : > { %1488 = vmatprep.mubr.f32.mxu1 %v603_v54  ;;  %v414_v45 = vld [vmem:[%s3556_s6 + $0x518] sm:$0xff]  ;;  %v476_v46 = vld [vmem:[%s3556_s6 + $0x708] sm:$0xff] }
  0xc8   : > { %3023 = vmatpush1.bf16.xpose.msra.mxu0 %v3022_v59  ;;  %v3054_v59 = vpack.c.bf16 %v465_v56, %v403_v55  ;;  %v411_v55 = vld [vmem:[%s3556_s6 + $0x500] sm:$0xff]  ;;  %v473_v56 = vld [vmem:[%s3556_s6 + $0x6f0] sm:$0xff] }
  0xc9   : > { %3031 = vmatpush1.bf16.xpose.msra.mxu1 %v3030_v60  ;;  %1362 = vmatprep.subr.mxu0 %v520_v61  ;;  %v3062_v60 = vpack.c.bf16 %v467_v58, %v405_v57  ;;  %v528_v61 = vld [vmem:[%s3556_s6 + $0x8a8] sm:$0xf]  ;;  %v413_v57 = vld [vmem:[%s3556_s6 + $0x510] sm:$0xff]  ;;  %v475_v58 = vld [vmem:[%s3556_s6 + $0x700] sm:$0xff] }
  0xca   : > { %1432 = vmatprep.subr.mxu1 %v522_v62  ;;  %v530_v62 = vld [vmem:[%s3556_s6 + $0x8b8] sm:$0xf] }
  0xd0   : > { %1363 = vmatpush1.xpose.msra.mxu0 %v519_v3  ;;  %v527_v3 = vld [vmem:[%s3556_s6 + $0x8a0] sm:$0xf] }
  0xd1   : > { %1433 = vmatpush1.xpose.msra.mxu1 %v521_v4  ;;  %3033 = vmatprep.subr.bf16.mxu0 %v3032_v5  ;;  %v529_v4 = vld [vmem:[%s3556_s6 + $0x8b0] sm:$0xf]  ;;  %v3064_v5 = vpack.c.bf16 %v346_v0, %v284_v63  ;;  %v292_v63 = vld [vmem:[%s3556_s6 + $0x148] sm:$0xff]  ;;  %v354_v0 = vld [vmem:[%s3556_s6 + $0x338] sm:$0xff] }
  0xd2   : > { %3041 = vmatprep.subr.bf16.mxu1 %v3040_v9  ;;  %v3072_v9 = vpack.c.bf16 %v348_v2, %v286_v1  ;;  %v294_v1 = vld [vmem:[%s3556_s6 + $0x158] sm:$0xff]  ;;  %v356_v2 = vld [vmem:[%s3556_s6 + $0x348] sm:$0xff] }
  0xd3   : > { %1419 = vmatmul.mubr.f32.vlgmr.msra.gmra.mrb[10].mxu0 %v230_v47  ;;  %v234_v47 = vld [vmem:[%s3570_s27 + $0x70] sm:$0xff] }
  0xd4   : > { %3035 = vmatpush1.bf16.xpose.msra.mxu0 %v3034_v16  ;;  %1489 = vmatmul.mubr.f32.vlgmr.msra.gmra.mrb[10].mxu1 %v231_v49  ;;  %v235_v49 = vld [vmem:[%s3570_s27 + $0x78] sm:$0xff]  ;;  %v606_v53 = vcombine.high %v234_v47, %v234_v47  ;;  %v3066_v16 = vpack.c.bf16 %v345_v7, %v283_v6 }
  0xd5   : > { %3043 = vmatpush1.bf16.xpose.msra.mxu1 %v3042_v18  ;;  %3037 = vmatprep.subr.bf16.mxu0 %v3036_v19  ;;  %v607_v54 = vcombine.high %v235_v49, %v235_v49  ;;  %v3074_v18 = vpack.c.bf16 %v347_v10, %v285_v8  ;;  %v3068_v19 = vpack.c.bf16 %v470_v12, %v408_v11  ;;  %v291_v6 = vld [vmem:[%s3556_s6 + $0x140] sm:$0xff]  ;;  %v353_v7 = vld [vmem:[%s3556_s6 + $0x330] sm:$0xff]  ;;  %v416_v11 = vld [vmem:[%s3556_s6 + $0x528] sm:$0xff] }
  0xd6   : > { %3045 = vmatprep.subr.bf16.mxu1 %v3044_v20  ;;  %1558 = vmatprep.mubr.f32.mxu0 %v604_v21  ;;  %v3076_v20 = vpack.c.bf16 %v472_v14, %v410_v13  ;;  %v293_v8 = vld [vmem:[%s3556_s6 + $0x150] sm:$0xff]  ;;  %v355_v10 = vld [vmem:[%s3556_s6 + $0x340] sm:$0xff]  ;;  %v478_v12 = vld [vmem:[%s3556_s6 + $0x718] sm:$0xff] }
  0xd7   : > { %1628 = vmatprep.mubr.f32.mxu1 %v605_v22  ;;  %v418_v13 = vld [vmem:[%s3556_s6 + $0x538] sm:$0xff]  ;;  %v480_v14 = vld [vmem:[%s3556_s6 + $0x728] sm:$0xff] }
  0xdc   : > { %3039 = vmatpush1.bf16.xpose.msra.mxu0 %v3038_v27  ;;  %v3070_v27 = vpack.c.bf16 %v469_v24, %v407_v23  ;;  %v415_v23 = vld [vmem:[%s3556_s6 + $0x520] sm:$0xff]  ;;  %v477_v24 = vld [vmem:[%s3556_s6 + $0x710] sm:$0xff] }
  0xdd   : > { %3047 = vmatpush1.bf16.xpose.msra.mxu1 %v3046_v28  ;;  %1502 = vmatprep.subr.mxu0 %v524_v29  ;;  %v3078_v28 = vpack.c.bf16 %v471_v26, %v409_v25  ;;  %v532_v29 = vld [vmem:[%s3556_s6 + $0x8c8] sm:$0xf]  ;;  %v417_v25 = vld [vmem:[%s3556_s6 + $0x530] sm:$0xff]  ;;  %v479_v26 = vld [vmem:[%s3556_s6 + $0x720] sm:$0xff] }
  0xde   : > { %1572 = vmatprep.subr.mxu1 %v526_v30  ;;  %v534_v30 = vld [vmem:[%s3556_s6 + $0x8d8] sm:$0xf] }
  0xe4   : > { %1503 = vmatpush1.xpose.msra.mxu0 %v523_v35  ;;  %v531_v35 = vld [vmem:[%s3556_s6 + $0x8c0] sm:$0xf] }
  0xe5   : > { %1573 = vmatpush1.xpose.msra.mxu1 %v525_v36  ;;  %3049 = vmatprep.subr.bf16.mxu0 %v3048_v37  ;;  %v533_v36 = vld [vmem:[%s3556_s6 + $0x8d0] sm:$0xf]  ;;  %v3080_v37 = vpack.c.bf16 %v350_v32, %v288_v31  ;;  %v296_v31 = vld [vmem:[%s3556_s6 + $0x168] sm:$0xff]  ;;  %v358_v32 = vld [vmem:[%s3556_s6 + $0x358] sm:$0xff] }
  0xe6   : > { %3057 = vmatprep.subr.bf16.mxu1 %v3056_v41  ;;  %v3088_v41 = vpack.c.bf16 %v352_v34, %v290_v33  ;;  %v298_v33 = vld [vmem:[%s3556_s6 + $0x178] sm:$0xff]  ;;  %v360_v34 = vld [vmem:[%s3556_s6 + $0x368] sm:$0xff] }
  0xe7   : > { %1559 = vmatmul.mubr.f32.vlgmr.msra.gmra.mrb[12].mxu0 %v232_v15  ;;  %v236_v15 = vld [vmem:[%s3570_s27 + $0x80] sm:$0xff] }
  0xe8   : > { %3051 = vmatpush1.bf16.xpose.msra.mxu0 %v3050_v48  ;;  %1629 = vmatmul.mubr.f32.vlgmr.msra.gmra.mrb[12].mxu1 %v233_v17  ;;  %v237_v17 = vld [vmem:[%s3570_s27 + $0x88] sm:$0xff]  ;;  %v608_v21 = vcombine.high %v236_v15, %v236_v15  ;;  %v3082_v48 = vpack.c.bf16 %v349_v39, %v287_v38 }
  0xe9   : > { %3059 = vmatpush1.bf16.xpose.msra.mxu1 %v3058_v50  ;;  %3053 = vmatprep.subr.bf16.mxu0 %v3052_v51  ;;  %v609_v22 = vcombine.high %v237_v17, %v237_v17  ;;  %v3090_v50 = vpack.c.bf16 %v351_v42, %v289_v40  ;;  %v3084_v51 = vpack.c.bf16 %v474_v44, %v412_v43  ;;  %v295_v38 = vld [vmem:[%s3556_s6 + $0x160] sm:$0xff]  ;;  %v357_v39 = vld [vmem:[%s3556_s6 + $0x350] sm:$0xff]  ;;  %v420_v43 = vld [vmem:[%s3556_s6 + $0x548] sm:$0xff] }
  0xea   : > { %3061 = vmatprep.subr.bf16.mxu1 %v3060_v52  ;;  %1698 = vmatprep.mubr.f32.mxu0 %v606_v53  ;;  %v3092_v52 = vpack.c.bf16 %v476_v46, %v414_v45  ;;  %v297_v40 = vld [vmem:[%s3556_s6 + $0x170] sm:$0xff]  ;;  %v359_v42 = vld [vmem:[%s3556_s6 + $0x360] sm:$0xff]  ;;  %v482_v44 = vld [vmem:[%s3556_s6 + $0x738] sm:$0xff] }
  0xeb   : > { %1768 = vmatprep.mubr.f32.mxu1 %v607_v54  ;;  %v422_v45 = vld [vmem:[%s3556_s6 + $0x558] sm:$0xff]  ;;  %v484_v46 = vld [vmem:[%s3556_s6 + $0x748] sm:$0xff] }
  0xf0   : > { %3055 = vmatpush1.bf16.xpose.msra.mxu0 %v3054_v59  ;;  %v3086_v59 = vpack.c.bf16 %v473_v56, %v411_v55  ;;  %v419_v55 = vld [vmem:[%s3556_s6 + $0x540] sm:$0xff]  ;;  %v481_v56 = vld [vmem:[%s3556_s6 + $0x730] sm:$0xff] }
  0xf1   : > { %3063 = vmatpush1.bf16.xpose.msra.mxu1 %v3062_v60  ;;  %1642 = vmatprep.subr.mxu0 %v528_v61  ;;  %v3094_v60 = vpack.c.bf16 %v475_v58, %v413_v57  ;;  %v536_v61 = vld [vmem:[%s3556_s6 + $0x8e8] sm:$0xf]  ;;  %v421_v57 = vld [vmem:[%s3556_s6 + $0x550] sm:$0xff]  ;;  %v483_v58 = vld [vmem:[%s3556_s6 + $0x740] sm:$0xff] }
  0xf2   : > { %1712 = vmatprep.subr.mxu1 %v530_v62  ;;  %v538_v62 = vld [vmem:[%s3556_s6 + $0x8f8] sm:$0xf] }
  0xf8   : > { %1643 = vmatpush1.xpose.msra.mxu0 %v527_v3  ;;  %v535_v3 = vld [vmem:[%s3556_s6 + $0x8e0] sm:$0xf] }
  0xf9   : > { %1713 = vmatpush1.xpose.msra.mxu1 %v529_v4  ;;  %3065 = vmatprep.subr.bf16.mxu0 %v3064_v5  ;;  %v537_v4 = vld [vmem:[%s3556_s6 + $0x8f0] sm:$0xf]  ;;  %v3096_v5 = vpack.c.bf16 %v354_v0, %v292_v63  ;;  %v300_v0 = vld [vmem:[%s3556_s6 + $0x188] sm:$0xff] }
  0xfa   : > { %3073 = vmatprep.subr.bf16.mxu1 %v3072_v9  ;;  %v3104_v9 = vpack.c.bf16 %v356_v2, %v294_v1  ;;  %v362_v1 = vld [vmem:[%s3556_s6 + $0x378] sm:$0xff] }
  0xfb   : > { %1699 = vmatmul.mubr.f32.vlgmr.msra.gmra.mrb[14].mxu0 %v234_v47  ;;  %v238_v47 = vld [vmem:[%s3570_s27 + $0x90] sm:$0xff] }
  0xfc   : > { %3067 = vmatpush1.bf16.xpose.msra.mxu0 %v3066_v16  ;;  %1769 = vmatmul.mubr.f32.vlgmr.msra.gmra.mrb[14].mxu1 %v235_v49  ;;  %v239_v49 = vld [vmem:[%s3570_s27 + $0x98] sm:$0xff]  ;;  %v610_v53 = vcombine.high %v238_v47, %v238_v47  ;;  %v3098_v16 = vpack.c.bf16 %v353_v7, %v291_v6  ;;  %v543_v7 = vld [vmem:[%s3556_s6 + $0x920] sm:$0xf] }
  0xfd   : > { %3075 = vmatpush1.bf16.xpose.msra.mxu1 %v3074_v18  ;;  %3069 = vmatprep.subr.bf16.mxu0 %v3068_v19  ;;  %v611_v54 = vcombine.high %v239_v49, %v239_v49  ;;  %v3106_v18 = vpack.c.bf16 %v355_v10, %v293_v8  ;;  %v3100_v19 = vpack.c.bf16 %v478_v12, %v416_v11  ;;  %v545_v8 = vld [vmem:[%s3556_s6 + $0x930] sm:$0xf]  ;;  %v299_v11 = vld [vmem:[%s3556_s6 + $0x180] sm:$0xff] }
  0xfe   : > { %3077 = vmatprep.subr.bf16.mxu1 %v3076_v20  ;;  %1838 = vmatprep.mubr.f32.mxu0 %v608_v21  ;;  %v3108_v20 = vpack.c.bf16 %v480_v14, %v418_v13  ;;  %v3128_v10 = vpack.c.bf16 %v362_v1, %v300_v0  ;;  %v361_v12 = vld [vmem:[%s3556_s6 + $0x370] sm:$0xff] }
  0xff   : > { %1908 = vmatprep.mubr.f32.mxu1 %v609_v22  ;;  %v301_v13 = vld [vmem:[%s3556_s6 + $0x190] sm:$0xff] }
 0x104   : > { %3071 = vmatpush1.bf16.xpose.msra.mxu0 %v3070_v27  ;;  %v3102_v27 = vpack.c.bf16 %v477_v24, %v415_v23 }
 0x105   : > { %3079 = vmatpush1.bf16.xpose.msra.mxu1 %v3078_v28  ;;  %1782 = vmatprep.subr.mxu0 %v532_v29  ;;  %v3110_v28 = vpack.c.bf16 %v479_v26, %v417_v25  ;;  %v540_v29 = vld [vmem:[%s3556_s6 + $0x908] sm:$0xf] }
 0x106   : > { %1852 = vmatprep.subr.mxu1 %v534_v30  ;;  %v542_v30 = vld [vmem:[%s3556_s6 + $0x918] sm:$0xf] }
 0x10c   : > { %1783 = vmatpush1.xpose.msra.mxu0 %v531_v35  ;;  %v539_v35 = vld [vmem:[%s3556_s6 + $0x900] sm:$0xf] }
 0x10d   : > { %1853 = vmatpush1.xpose.msra.mxu1 %v533_v36  ;;  %3081 = vmatprep.subr.bf16.mxu0 %v3080_v37  ;;  %v541_v36 = vld [vmem:[%s3556_s6 + $0x910] sm:$0xf]  ;;  %v3112_v37 = vpack.c.bf16 %v358_v32, %v296_v31  ;;  %v487_v31 = vld [vmem:[%s3556_s6 + $0x760] sm:$0xff] }
 0x10e   : > { %3089 = vmatprep.subr.bf16.mxu1 %v3088_v41  ;;  %v3120_v41 = vpack.c.bf16 %v360_v34, %v298_v33  ;;  %v548_v34 = vld [vmem:[%s3556_s6 + $0x948] sm:$0xf] }
 0x10f   : > { %1839 = vmatmul.mubr.f32.vlgmr.msra.gmra.mrb[16].mxu0 %v236_v15  ;;  %v240_v15 = vld [vmem:[%s3570_s27 + $0xa0] sm:$0xff] }
 0x110   : > { %3083 = vmatpush1.bf16.xpose.msra.mxu0 %v3082_v48  ;;  %1909 = vmatmul.mubr.f32.vlgmr.msra.gmra.mrb[16].mxu1 %v237_v17  ;;  %v241_v17 = vld [vmem:[%s3570_s27 + $0xa8] sm:$0xff]  ;;  %v612_v21 = vcombine.high %v240_v15, %v240_v15  ;;  %v3114_v48 = vpack.c.bf16 %v357_v39, %v295_v38 }
 0x111   : > { %3091 = vmatpush1.bf16.xpose.msra.mxu1 %v3090_v50  ;;  %3085 = vmatprep.subr.bf16.mxu0 %v3084_v51  ;;  %v613_v22 = vcombine.high %v241_v17, %v241_v17  ;;  %v3122_v50 = vpack.c.bf16 %v359_v42, %v297_v40  ;;  %v3116_v51 = vpack.c.bf16 %v482_v44, %v420_v43  ;;  %v366_v38 = vld [vmem:[%s3556_s6 + $0x398] sm:$0xff]  ;;  %v368_v43 = vld [vmem:[%s3556_s6 + $0x3a8] sm:$0xff]  ;;  %v547_v44 = vld [vmem:[%s3556_s6 + $0x940] sm:$0xf] }
 0x112   : > { %3093 = vmatprep.subr.bf16.mxu1 %v3092_v52  ;;  %1978 = vmatprep.mubr.f32.mxu0 %v610_v53  ;;  %v3124_v52 = vpack.c.bf16 %v484_v46, %v422_v45  ;;  %v306_v42 = vld [vmem:[%s3556_s6 + $0x1b8] sm:$0xff]  ;;  %v549_v45 = vld [vmem:[%s3556_s6 + $0x950] sm:$0xf] }
 0x113   : > { %2048 = vmatprep.mubr.f32.mxu1 %v611_v54 }
 0x118   : > { %3087 = vmatpush1.bf16.xpose.msra.mxu0 %v3086_v59  ;;  %v3118_v59 = vpack.c.bf16 %v481_v56, %v419_v55  ;;  %v490_v55 = vld [vmem:[%s3556_s6 + $0x778] sm:$0xff] }
 0x119   : > { %3095 = vmatpush1.bf16.xpose.msra.mxu1 %v3094_v60  ;;  %1922 = vmatprep.subr.mxu0 %v536_v61  ;;  %v3126_v60 = vpack.c.bf16 %v483_v58, %v421_v57  ;;  %v544_v61 = vld [vmem:[%s3556_s6 + $0x928] sm:$0xf]  ;;  %v430_v56 = vld [vmem:[%s3556_s6 + $0x598] sm:$0xff] }
 0x11a   : > { %1992 = vmatprep.subr.mxu1 %v538_v62  ;;  %v546_v62 = vld [vmem:[%s3556_s6 + $0x938] sm:$0xf]  ;;  %v492_v57 = vld [vmem:[%s3556_s6 + $0x788] sm:$0xff] }
 0x11b   : > { %v3891_v58 = vld [vmem:[%s3570_s27 + $0xd0] sm:$0xff] }
 0x11c   : > { %v618_v0 = vcombine.high %v3891_v58, %v3891_v58 }
 0x120   : > { %1923 = vmatpush1.xpose.msra.mxu0 %v535_v3 }
 0x121   : > { %1993 = vmatpush1.xpose.msra.mxu1 %v537_v4  ;;  %3097 = vmatprep.subr.bf16.mxu0 %v3096_v5  ;;  %v302_v4 = vld [vmem:[%s3556_s6 + $0x198] sm:$0xff]  ;;  %v364_v5 = vld [vmem:[%s3556_s6 + $0x388] sm:$0xff] }
 0x122   : > { %3105 = vmatprep.subr.bf16.mxu1 %v3104_v9  ;;  %v3136_v14 = vpack.c.bf16 %v364_v5, %v302_v4  ;;  %v429_v4 = vld [vmem:[%s3556_s6 + $0x590] sm:$0xff]  ;;  %v491_v5 = vld [vmem:[%s3556_s6 + $0x780] sm:$0xff] }
 0x123   : > { %1979 = vmatmul.mubr.f32.vlgmr.msra.gmra.mrb[18].mxu0 %v238_v47  ;;  %v3829_v47 = vld [vmem:[%s3570_s27 + $0xb0] sm:$0xff] }
 0x124   : > { %3099 = vmatpush1.bf16.xpose.msra.mxu0 %v3098_v16  ;;  %2049 = vmatmul.mubr.f32.vlgmr.msra.gmra.mrb[18].mxu1 %v239_v49  ;;  %v3832_v49 = vld [vmem:[%s3570_s27 + $0xb8] sm:$0xff]  ;;  %v614_v53 = vcombine.high %v3829_v47, %v3829_v47 }
 0x125   : > { %3107 = vmatpush1.bf16.xpose.msra.mxu1 %v3106_v18  ;;  %3101 = vmatprep.subr.bf16.mxu0 %v3100_v19  ;;  %v615_v54 = vcombine.high %v3832_v49, %v3832_v49  ;;  %v424_v16 = vld [vmem:[%s3556_s6 + $0x568] sm:$0xff]  ;;  %v426_v18 = vld [vmem:[%s3556_s6 + $0x578] sm:$0xff] }
 0x126   : > { %3109 = vmatprep.subr.bf16.mxu1 %v3108_v20  ;;  %2118 = vmatprep.mubr.f32.mxu0 %v612_v21  ;;  %v488_v19 = vld [vmem:[%s3556_s6 + $0x768] sm:$0xff]  ;;  %v3130_v21 = vpack.c.bf16 %v361_v12, %v299_v11  ;;  %v370_v12 = vld [vmem:[%s3556_s6 + $0x3b8] sm:$0xff] }
 0x127   : > { %2188 = vmatprep.mubr.f32.mxu1 %v613_v22  ;;  %v3859_v20 = vld [vmem:[%s3570_s27 + $0xc0] sm:$0xff]  ;;  %v3862_v22 = vld [vmem:[%s3570_s27 + $0xc8] sm:$0xff]  ;;  %v3140_v25 = vpack.c.bf16 %v488_v19, %v426_v18 }
 0x128   : > { %v616_v26 = vcombine.high %v3859_v20, %v3859_v20  ;;  %v308_v11 = vld [vmem:[%s3556_s6 + $0x1c8] sm:$0xff]  ;;  %v551_v18 = vld [vmem:[%s3556_s6 + $0x960] sm:$0xf]  ;;  %v553_v19 = vld [vmem:[%s3556_s6 + $0x970] sm:$0xf] }
 0x12c   : > { %3103 = vmatpush1.bf16.xpose.msra.mxu0 %v3102_v27  ;;  %v617_v27 = vcombine.high %v3862_v22, %v3862_v22 }
 0x12d   : > { %3111 = vmatpush1.bf16.xpose.msra.mxu1 %v3110_v28  ;;  %2062 = vmatprep.subr.mxu0 %v540_v29  ;;  %v423_v28 = vld [vmem:[%s3556_s6 + $0x560] sm:$0xff]  ;;  %v485_v29 = vld [vmem:[%s3556_s6 + $0x750] sm:$0xff] }
 0x12e   : > { %2132 = vmatprep.subr.mxu1 %v542_v30  ;;  %v425_v30 = vld [vmem:[%s3556_s6 + $0x570] sm:$0xff]  ;;  %v3134_v32 = vpack.c.bf16 %v485_v29, %v423_v28  ;;  %v432_v28 = vld [vmem:[%s3556_s6 + $0x5a8] sm:$0xff]  ;;  %v494_v29 = vld [vmem:[%s3556_s6 + $0x798] sm:$0xff] }
 0x12f   : > { %v3142_v33 = vpack.c.bf16 %v487_v31, %v425_v30  ;;  %v434_v30 = vld [vmem:[%s3556_s6 + $0x5b8] sm:$0xff]  ;;  %v496_v31 = vld [vmem:[%s3556_s6 + $0x7a8] sm:$0xff] }
 0x134   : > { %2063 = vmatpush1.xpose.msra.mxu0 %v539_v35  ;;  %v550_v35 = vld [vmem:[%s3556_s6 + $0x958] sm:$0xf] }
 0x135   : > { %2133 = vmatpush1.xpose.msra.mxu1 %v541_v36  ;;  %3113 = vmatprep.subr.bf16.mxu0 %v3112_v37  ;;  %v304_v37 = vld [vmem:[%s3556_s6 + $0x1a8] sm:$0xff] }
 0x136   : > { %3121 = vmatprep.subr.bf16.mxu1 %v3120_v41 }
 0x137   : > { %2119 = vmatmul.mubr.f32.vlgmr.msra.gmra.mrb[20].mxu0 %v240_v15  ;;  %v363_v15 = vld [vmem:[%s3556_s6 + $0x380] sm:$0xff] }
 0x138   : > { %3115 = vmatpush1.bf16.xpose.msra.mxu0 %v3114_v48  ;;  %2189 = vmatmul.mubr.f32.vlgmr.msra.gmra.mrb[20].mxu1 %v241_v17  ;;  %v486_v17 = vld [vmem:[%s3556_s6 + $0x758] sm:$0xff]  ;;  %v3138_v23 = vpack.c.bf16 %v363_v15, %v301_v13  ;;  %v3144_v48 = vpack.c.bf16 %v366_v38, %v304_v37  ;;  %v3172_v37 = vpack.c.bf16 %v496_v31, %v434_v30 }
 0x139   : > { %3123 = vmatpush1.bf16.xpose.msra.mxu1 %v3122_v50  ;;  %3117 = vmatprep.subr.bf16.mxu0 %v3116_v51  ;;  %v3132_v24 = vpack.c.bf16 %v486_v17, %v424_v16  ;;  %v365_v50 = vld [vmem:[%s3556_s6 + $0x390] sm:$0xff]  ;;  %v310_v16 = vld [vmem:[%s3556_s6 + $0x1d8] sm:$0xff]  ;;  %v372_v17 = vld [vmem:[%s3556_s6 + $0x3c8] sm:$0xff] }
 0x13a   : > { %3125 = vmatprep.subr.bf16.mxu1 %v3124_v52  ;;  %2258 = vmatprep.mubr.f32.mxu0 %v614_v53  ;;  %v305_v51 = vld [vmem:[%s3556_s6 + $0x1b0] sm:$0xff]  ;;  %v3152_v52 = vpack.c.bf16 %v368_v43, %v306_v42  ;;  %v367_v53 = vld [vmem:[%s3556_s6 + $0x3a0] sm:$0xff] }
 0x13b   : > { %2328 = vmatprep.mubr.f32.mxu1 %v615_v54  ;;  %v428_v54 = vld [vmem:[%s3556_s6 + $0x588] sm:$0xff]  ;;  %v433_v42 = vld [vmem:[%s3556_s6 + $0x5b0] sm:$0xff]  ;;  %v495_v43 = vld [vmem:[%s3556_s6 + $0x7a0] sm:$0xff] }
 0x140   : > { %3119 = vmatpush1.bf16.xpose.msra.mxu0 %v3118_v59 }
 0x141   : > { %3127 = vmatpush1.bf16.xpose.msra.mxu1 %v3126_v60  ;;  %2202 = vmatprep.subr.mxu0 %v544_v61  ;;  %v3894_v60 = vld [vmem:[%s3570_s27 + $0xd8] sm:$0xff]  ;;  %v3154_v61 = vpack.c.bf16 %v367_v53, %v305_v51 }
 0x142   : > { %v720_v63 = vpop.f32.mrb[0].mxu0  ;;  %2272 = vmatprep.subr.mxu1 %v546_v62  ;;  %v3148_v62 = vpack.c.bf16 %v490_v55, %v428_v54  ;;  %v619_v1 = vcombine.high %v3894_v60, %v3894_v60  ;;  %v555_v54 = vld [vmem:[%s3556_s6 + $0x980] sm:$0xf] }
 0x143   : > { %v722_v2 = vpop.f32.mrb[1].mxu0  ;;  %v790_v3 = vpop.f32.mrb[0].mxu1 }
 0x144   : > { %v791_v6 = vadd.f32 %v790_v3, %v720_v63  ;;  %v792_v9 = vpop.f32.mrb[1].mxu1  ;;  %v3156_v63 = vpack.c.bf16 %v492_v57, %v430_v56  ;;  %v427_v2 = vld [vmem:[%s3556_s6 + $0x580] sm:$0xff]  ;;  %v489_v3 = vld [vmem:[%s3556_s6 + $0x770] sm:$0xff] }
 0x145   : > { %v554_v9 = vld [vmem:[%s3556_s6 + $0x978] sm:$0xf]  ;;  %v557_v57 = vld [vmem:[%s3556_s6 + $0x990] sm:$0xf] }
 0x148   : > { %2203 = vmatpush1.xpose.msra.mxu0 %v543_v7  ;;  %v3158_v7 = vpack.c.bf16 %v491_v5, %v429_v4  ;;  %v497_v4 = vld [vmem:[%s3556_s6 + $0x7b0] sm:$0xff] }
 0x149   : > { %2273 = vmatpush1.xpose.msra.mxu1 %v545_v8  ;;  %3129 = vmatprep.subr.bf16.mxu0 %v3128_v10  ;;  %v552_v8 = vld [vmem:[%s3556_s6 + $0x968] sm:$0xf] }
 0x14a   : > { %3137 = vmatprep.subr.bf16.mxu1 %v3136_v14 }
 0x14b   : > { %2259 = vmatmul.mubr.f32.vlgmr.msra.gmra.mrb[22].mxu0 %v3829_v47 }
 0x14c   : > { %3131 = vmatpush1.bf16.xpose.msra.mxu0 %v3130_v21  ;;  %2329 = vmatmul.mubr.f32.vlgmr.msra.gmra.mrb[22].mxu1 %v3832_v49  ;;  %v303_v49 = vld [vmem:[%s3556_s6 + $0x1a0] sm:$0xff] }
 0x14d   : > { %3139 = vmatpush1.bf16.xpose.msra.mxu1 %v3138_v23  ;;  %3133 = vmatprep.subr.bf16.mxu0 %v3132_v24  ;;  %v3146_v59 = vpack.c.bf16 %v365_v50, %v303_v49  ;;  %v307_v23 = vld [vmem:[%s3556_s6 + $0x1c0] sm:$0xff]  ;;  %v369_v24 = vld [vmem:[%s3556_s6 + $0x3b0] sm:$0xff]  ;;  %v312_v49 = vld [vmem:[%s3556_s6 + $0x1e8] sm:$0xff] }
 0x14e   : > { %3141 = vmatprep.subr.bf16.mxu1 %v3140_v25  ;;  %2398 = vmatprep.mubr.f32.mxu0 %v616_v26  ;;  %v309_v25 = vld [vmem:[%s3556_s6 + $0x1d0] sm:$0xff]  ;;  %v3168_v26 = vpack.c.bf16 %v372_v17, %v310_v16  ;;  %v374_v50 = vld [vmem:[%s3556_s6 + $0x3d8] sm:$0xff] }
 0x14f   : > { %2468 = vmatprep.mubr.f32.mxu1 %v617_v27  ;;  %v371_v27 = vld [vmem:[%s3556_s6 + $0x3c0] sm:$0xff] }
 0x154   : > { %3135 = vmatpush1.bf16.xpose.msra.mxu0 %v3134_v32  ;;  %v248_v32 = vld [vmem:[%s3570_s27 + $0xe0] sm:$0xff] }
 0x155   : > { %3143 = vmatpush1.bf16.xpose.msra.mxu1 %v3142_v33  ;;  %2342 = vmatprep.subr.mxu0 %v548_v34  ;;  %v3162_v33 = vpack.c.bf16 %v369_v24, %v307_v23  ;;  %v249_v34 = vld [vmem:[%s3570_s27 + $0xe8] sm:$0xff]  ;;  %v620_v38 = vcombine.high %v248_v32, %v248_v32 }
 0x156   : > { %v860_v36 = vpop.f32.mrb[2].mxu0  ;;  %2412 = vmatprep.subr.mxu1 %v550_v35  ;;  %v3170_v35 = vpack.c.bf16 %v371_v27, %v309_v25 }
 0x157   : > { %v861_v39 = vadd.f32 %v860_v36, %v791_v6  ;;  %v862_v40 = vpop.f32.mrb[3].mxu0  ;;  %v930_v41 = vpop.f32.mrb[2].mxu1  ;;  %v3150_v6 = vpack.c.bf16 %v489_v3, %v427_v2  ;;  %v3164_v36 = vpack.c.bf16 %v494_v29, %v432_v28  ;;  %v435_v3 = vld [vmem:[%s3556_s6 + $0x5c0] sm:$0xff] }
 0x158   : > { %v932_v46 = vpop.f32.mrb[3].mxu1  ;;  %v431_v40 = vld [vmem:[%s3556_s6 + $0x5a0] sm:$0xff]  ;;  %v3182_v5 = vpack.c.bf16 %v497_v4, %v435_v3 }
 0x159   : > { %v931_v47 = vadd.f32 %v930_v41, %v861_v39  ;;  %v621_v39 = vcombine.high %v249_v34, %v249_v34  ;;  %v493_v41 = vld [vmem:[%s3556_s6 + $0x790] sm:$0xff]  ;;  %v556_v46 = vld [vmem:[%s3556_s6 + $0x988] sm:$0xf] }
 0x15c   : > { %2343 = vmatpush1.xpose.msra.mxu0 %v547_v44  ;;  %v3166_v44 = vpack.c.bf16 %v493_v41, %v431_v40 }
 0x15d   : > { %2413 = vmatpush1.xpose.msra.mxu1 %v549_v45  ;;  %3145 = vmatprep.subr.bf16.mxu0 %v3144_v48  ;;  %v3174_v45 = vpack.c.bf16 %v495_v43, %v433_v42 }
 0x15e   : > { %3153 = vmatprep.subr.bf16.mxu1 %v3152_v52 }
 0x15f   : > { %2399 = vmatmul.mubr.f32.vlgmr.msra.gmra.mrb[24].mxu0 %v3859_v20 }
 0x160   : > { %3147 = vmatpush1.bf16.xpose.msra.mxu0 %v3146_v59  ;;  %2469 = vmatmul.mubr.f32.vlgmr.msra.gmra.mrb[24].mxu1 %v3862_v22  ;;  %v3160_v22 = vpack.c.bf16 %v370_v12, %v308_v11  ;;  %v311_v59 = vld [vmem:[%s3556_s6 + $0x1e0] sm:$0xff] }
 0x161   : > { %3155 = vmatpush1.bf16.xpose.msra.mxu1 %v3154_v61  ;;  %3149 = vmatprep.subr.bf16.mxu0 %v3148_v62  ;;  %v436_v61 = vld [vmem:[%s3556_s6 + $0x5c8] sm:$0xff]  ;;  %v498_v62 = vld [vmem:[%s3556_s6 + $0x7b8] sm:$0xff] }
 0x162   : > { %3157 = vmatprep.subr.bf16.mxu1 %v3156_v63  ;;  %2538 = vmatprep.mubr.f32.mxu0 %v618_v0  ;;  %v250_v63 = vld [vmem:[%s3570_s27 + $0xf0] sm:$0xff] }
 0x163   : > { %2608 = vmatprep.mubr.f32.mxu1 %v619_v1  ;;  %v3180_v1 = vpack.c.bf16 %v498_v62, %v436_v61  ;;  %v622_v2 = vcombine.high %v250_v63, %v250_v63 }
 0x168   : > { %3151 = vmatpush1.bf16.xpose.msra.mxu0 %v3150_v6  ;;  %v560_v6 = vld [vmem:[%s3556_s6 + $0x9a8] sm:$0xf] }
 0x169   : > { %3159 = vmatpush1.bf16.xpose.msra.mxu1 %v3158_v7  ;;  %2482 = vmatprep.subr.mxu0 %v552_v8 }
 0x16a   : > { %v1000_v10 = vpop.f32.mrb[4].mxu0  ;;  %2552 = vmatprep.subr.mxu1 %v554_v9 }
 0x16b   : > { %v1001_v13 = vadd.f32 %v1000_v10, %v931_v47  ;;  %v1002_v14 = vpop.f32.mrb[5].mxu0  ;;  %v1070_v15 = vpop.f32.mrb[4].mxu1  ;;  %v558_v47 = vld [vmem:[%s3556_s6 + $0x998] sm:$0xf] }
 0x16c   : > { %v1072_v20 = vpop.f32.mrb[5].mxu1 }
 0x16d   : > { %v1071_v21 = vadd.f32 %v1070_v15, %v1001_v13  ;;  %v559_v13 = vld [vmem:[%s3556_s6 + $0x9a0] sm:$0xf] }
 0x170   : > { %2483 = vmatpush1.xpose.msra.mxu0 %v551_v18 }
 0x171   : > { %2553 = vmatpush1.xpose.msra.mxu1 %v553_v19  ;;  %3161 = vmatprep.subr.bf16.mxu0 %v3160_v22 }
 0x172   : > { %3169 = vmatprep.subr.bf16.mxu1 %v3168_v26 }
 0x173   : > { %2539 = vmatmul.mubr.f32.vlgmr.msra.gmra.mrb[26].mxu0 %v3891_v58  ;;  %v3176_v58 = vpack.c.bf16 %v374_v50, %v312_v49 }
 0x174   : > { %3163 = vmatpush1.bf16.xpose.msra.mxu0 %v3162_v33  ;;  %2609 = vmatmul.mubr.f32.vlgmr.msra.gmra.mrb[26].mxu1 %v3894_v60  ;;  %v373_v60 = vld [vmem:[%s3556_s6 + $0x3d0] sm:$0xff] }
 0x175   : > { %3171 = vmatpush1.bf16.xpose.msra.mxu1 %v3170_v35  ;;  %3165 = vmatprep.subr.bf16.mxu0 %v3164_v36  ;;  %v3178_v0 = vpack.c.bf16 %v373_v60, %v311_v59 }
 0x176   : > { %3173 = vmatprep.subr.bf16.mxu1 %v3172_v37  ;;  %2678 = vmatprep.mubr.f32.mxu0 %v620_v38 }
 0x177   : > { %2748 = vmatprep.mubr.f32.mxu1 %v621_v39 }
 0x17c   : > { %3167 = vmatpush1.bf16.xpose.msra.mxu0 %v3166_v44 }
 0x17d   : > { %3175 = vmatpush1.bf16.xpose.msra.mxu1 %v3174_v45  ;;  %2622 = vmatprep.subr.mxu0 %v556_v46 }
 0x17e   : > { %v1140_v48 = vpop.f32.mrb[6].mxu0  ;;  %2692 = vmatprep.subr.mxu1 %v558_v47 }
 0x17f   : > { %v1141_v51 = vadd.f32 %v1140_v48, %v1071_v21  ;;  %v1142_v52 = vpop.f32.mrb[7].mxu0  ;;  %v1210_v53 = vpop.f32.mrb[6].mxu1 }
 0x180   : > { %v1212_v55 = vpop.f32.mrb[7].mxu1 }
 0x181   : > { %v1211_v56 = vadd.f32 %v1210_v53, %v1141_v51 }
 0x184   : > { %2623 = vmatpush1.xpose.msra.mxu0 %v555_v54 }
 0x185   : > { %2693 = vmatpush1.xpose.msra.mxu1 %v557_v57  ;;  %3177 = vmatprep.subr.bf16.mxu0 %v3176_v58 }
 0x187   : > { %2679 = vmatmul.mubr.f32.vlgmr.msra.gmra.mrb[28].mxu0 %v248_v32 }
 0x188   : > { %3179 = vmatpush1.bf16.xpose.msra.mxu0 %v3178_v0  ;;  %2749 = vmatmul.mubr.f32.vlgmr.msra.gmra.mrb[28].mxu1 %v249_v34 }
 0x189   : > { %3181 = vmatprep.subr.bf16.mxu0 %v3180_v1  ;;  %2818 = vmatprep.mubr.f32.mxu0 %v622_v2 }
 0x190   : > { %3183 = vmatpush1.bf16.xpose.msra.mxu0 %v3182_v5 }
 0x191   : > { %2762 = vmatprep.subr.mxu0 %v560_v6 }
 0x192   : > { %v1280_v7 = vpop.f32.mrb[8].mxu0 }
 0x193   : > { %v1281_v8 = vadd.f32 %v1280_v7, %v1211_v56  ;;  %v1282_v9 = vpop.f32.mrb[9].mxu0  ;;  %v1350_v10 = vpop.f32.mrb[8].mxu1 }
 0x194   : > { %v1352_v11 = vpop.f32.mrb[9].mxu1 }
 0x195   : > { %v1351_v12 = vadd.f32 %v1350_v10, %v1281_v8  ;;  %v219_v10 = vld [vmem:[#allocation2] sm:$0xf] }
 0x198   : > { %2763 = vmatpush1.xpose.msra.mxu0 %v559_v13 }
 0x19b   : > { %2819 = vmatmul.mubr.f32.vlgmr.msra.gmra.mrb[30].mxu0 %v250_v63 }
 0x1a6   : > { %v1420_v14 = vpop.f32.mrb[10].mxu0 }
 0x1a7   : > { %v1421_v15 = vadd.f32 %v1420_v14, %v1351_v12  ;;  %v1422_v16 = vpop.f32.mrb[11].mxu0  ;;  %v1490_v17 = vpop.f32.mrb[10].mxu1 }
 0x1a8   : > { %v1492_v18 = vpop.f32.mrb[11].mxu1  ;;  %v2930_v16 = vld [vmem:[#allocation6] ss:$0 sm:$0xff] (!%p2929_p4) }
 0x1a9   : > { %v1491_v19 = vadd.f32 %v1490_v17, %v1421_v15 }
 0x1ba   : > { %v1560_v20 = vpop.f32.mrb[12].mxu0 }
 0x1bb   : > { %v1561_v21 = vadd.f32 %v1560_v20, %v1491_v19  ;;  %v1562_v22 = vpop.f32.mrb[13].mxu0  ;;  %v1630_v23 = vpop.f32.mrb[12].mxu1 }
 0x1bc   : > { %v1632_v24 = vpop.f32.mrb[13].mxu1 }
 0x1bd   : > { %v1631_v25 = vadd.f32 %v1630_v23, %v1561_v21 }
 0x1ce   : > { %v1700_v26 = vpop.f32.mrb[14].mxu0 }
 0x1cf   : > { %v1701_v27 = vadd.f32 %v1700_v26, %v1631_v25  ;;  %v1702_v28 = vpop.f32.mrb[15].mxu0  ;;  %v1770_v29 = vpop.f32.mrb[14].mxu1 }
 0x1d0   : > { %v1772_v30 = vpop.f32.mrb[15].mxu1 }
 0x1d1   : > { %v1771_v31 = vadd.f32 %v1770_v29, %v1701_v27 }
 0x1e2   : > { %v1840_v32 = vpop.f32.mrb[16].mxu0 }
 0x1e3   : > { %v1841_v33 = vadd.f32 %v1840_v32, %v1771_v31  ;;  %v1842_v34 = vpop.f32.mrb[17].mxu0  ;;  %v1910_v35 = vpop.f32.mrb[16].mxu1 }
 0x1e4   : > { %v1912_v36 = vpop.f32.mrb[17].mxu1 }
 0x1e5   : > { %v1911_v37 = vadd.f32 %v1910_v35, %v1841_v33 }
 0x1f6   : > { %v1980_v38 = vpop.f32.mrb[18].mxu0 }
 0x1f7   : > { %v1981_v39 = vadd.f32 %v1980_v38, %v1911_v37  ;;  %v1982_v40 = vpop.f32.mrb[19].mxu0  ;;  %v2050_v41 = vpop.f32.mrb[18].mxu1 }
 0x1f8   : > { %v2052_v42 = vpop.f32.mrb[19].mxu1 }
 0x1f9   : > { %v2051_v43 = vadd.f32 %v2050_v41, %v1981_v39 }
 0x20a   : > { %v2120_v44 = vpop.f32.mrb[20].mxu0 }
 0x20b   : > { %v2121_v45 = vadd.f32 %v2120_v44, %v2051_v43  ;;  %v2122_v46 = vpop.f32.mrb[21].mxu0  ;;  %v2190_v47 = vpop.f32.mrb[20].mxu1 }
 0x20c   : > { %v2192_v48 = vpop.f32.mrb[21].mxu1 }
 0x20d   : > { %v2191_v49 = vadd.f32 %v2190_v47, %v2121_v45 }
 0x21e   : > { %v2260_v50 = vpop.f32.mrb[22].mxu0 }
 0x21f   : > { %v2261_v51 = vadd.f32 %v2260_v50, %v2191_v49  ;;  %v2262_v52 = vpop.f32.mrb[23].mxu0  ;;  %v2330_v53 = vpop.f32.mrb[22].mxu1 }
 0x220   : > { %v2332_v54 = vpop.f32.mrb[23].mxu1 }
 0x221   : > { %v2331_v55 = vadd.f32 %v2330_v53, %v2261_v51 }
 0x232   : > { %v2400_v56 = vpop.f32.mrb[24].mxu0 }
 0x233   : > { %v2401_v57 = vadd.f32 %v2400_v56, %v2331_v55  ;;  %v2402_v58 = vpop.f32.mrb[25].mxu0  ;;  %v2470_v59 = vpop.f32.mrb[24].mxu1 }
 0x234   : > { %v2472_v60 = vpop.f32.mrb[25].mxu1 }
 0x235   : > { %v2471_v61 = vadd.f32 %v2470_v59, %v2401_v57 }
 0x246   : > { %v2540_v62 = vpop.f32.mrb[26].mxu0 }
 0x247   : > { %v2541_v63 = vadd.f32 %v2540_v62, %v2471_v61  ;;  %v2542_v0 = vpop.f32.mrb[27].mxu0  ;;  %v2610_v1 = vpop.f32.mrb[26].mxu1 }
 0x248   : > { %v2612_v2 = vpop.f32.mrb[27].mxu1 }
 0x249   : > { %v2611_v3 = vadd.f32 %v2610_v1, %v2541_v63 }
 0x25a   : > { %v2680_v4 = vpop.f32.mrb[28].mxu0 }
 0x25b   : > { %v2681_v5 = vadd.f32 %v2680_v4, %v2611_v3  ;;  %v2682_v6 = vpop.f32.mrb[29].mxu0  ;;  %v2750_v7 = vpop.f32.mrb[28].mxu1 }
 0x25c   : > { %v2752_v8 = vpop.f32.mrb[29].mxu1 }
 0x25d   : > { %v2751_v9 = vadd.f32 %v2750_v7, %v2681_v5 }
 0x26d   : > { %2830 = sbr.rel (%p2929_p4) target bundleno = 638 (0x27e), region = 48 }
 0x26e   : > { %v2820_v11 = vpop.f32.mrb[30].mxu0 }
 0x26f   : > { %v2821_v12 = vadd.f32 %v2820_v11, %v2751_v9  ;;  %v2822_v13 = vpop.f32.mrb[31].mxu0 }
 0x271   : > { %v2824_v14 = vadd.f32 %v2821_v12, %v219_v10 }
 0x273   : > { %2826 = vst.msk [vmem:[#allocation2] sm:$0xf] %vm2825_vm1, %v2824_v14 }
 0x27a   : > { %v2831_v15 = vld [vmem:[#allocation2] sm:$0xf] }
 0x27b   : > { %v2839_v17 = vadd.f32 %v2930_v16, %v2831_v15 }
 0x27d   : > { %2840 = vst.msk [vmem:[#allocation8] sm:$0xf] %vm2825_vm1, %v2839_v17 }
 0x27e PF: > { %p3207_p7 = scmp.eq.s32.totalorder %s3452_s16, 2  ;;  %s3412_s22 = smov [#allocation8]  }
 0x27f   : > { %s2848_s25 = sshll.u32 %s3412_s22, 4  ;;  %s2849_s25 = int_to_ptr.vmem [resolvable:$true] %s2848_s25 }
 0x280   : > { %s3336_s30 = scalar_lea.vmem %s2849_s25, 64  ;;  %p3343_p10 = scmp.lt.s32.totalorder %s2849_s25, %s2849_s25 }
 0x281   : > { %p3337_p11 = scmp.ne.s32.totalorder %s2849_s25, %s3336_s30  ;;  %p3344_p0 = scmp.lt.s32.totalorder %s3336_s30, %s3336_s30 }
 0x283   : > { %p3338_p12 = pnand %p3337_p11, %p3207_p7  ;;  %p3345_p1 = por %p3344_p0, %p3343_p10 }
 0x285   : > { %p3339_p5 = pneg %p3338_p12 }
 0x287   : > { %p3346_p9 = pnand %p3345_p1, %p3339_p5 }
 0x289   : > { %3349 = shalt.err (!%p3346_p9)
}
 0x28a   : > { %s3350_s9 = scalar_lea.hbm %s3985_s3, 64 }
 0x28b   : > { %p3351_p13 = scmp.ne.s32.totalorder %s3985_s3, %s3350_s9  ;;  %p3356_p3 = scmp.lt.u32.totalorder %s3350_s9, %s3985_s3 }
 0x28d   : > { %p3352_p2 = pnand %p3351_p13, %p3207_p7 }
 0x28f   : > { %p3353_p8 = pneg %p3352_p2 }
 0x291   : > { %p3358_p6 = pnand %p3356_p3, %p3353_p8 }
 0x293   : > { %3361 = shalt.err (!%p3358_p6)
}
 0x294   : > { %3193 = dma.vmem_to_hbm [thread:$0]  (%p3207_p7), %s2849_s25, 64, %s3985_s3, [#allocation5]  }
 0x295   : > { %3387 = dma.done.wait (%p3207_p7), [#allocation5], 64  }
 0x296   : > { %3389 = vsyncadd (%p3207_p7), [#allocation5], 4294967232 }
 0x297 PF: > { %p15_p4 = scmp.ge.s32.totalorder %s3455_s17, 5   ;;  %s4001_s12 = smov %s3396_s13 }
 0x298   : > { %s4002_s13 = smov %s3400_s14  ;;  %s4003_s14 = smov %s3465_s20 }
 0x299   : > { %s4004_s15 = smov %s3455_s17  ;;  %17 = sbr.rel (!%p15_p4) target bundleno = 5 (0x5), region = 84 }
 0x2a0   :  { %2861 = vsyncpa [#allocation4], 1 }
 0x2a1   :  { %2863 = vsyncpa [#allocation4 + $0x1], 1 }
 0x2a2   :  { %2864 = vsyncpa [#allocation7], 1 }
 0x2a3   :  { %2865 = vsyncpa [#allocation5], 1 }
 0x2a4   :  { %2867 = vsyncpa [#allocation5 + $0x1], 1 }

</bundles_post_ra>
